<compile_context>
chip_gen: v6e
topology: v6e:2x2x1
jax: 0.10.0
libtpu: 0.0.40
codegen_flags: <defaults>
</compile_context>

<pallas_src>
import functools
import math

import jax
import jax.numpy as jnp
from jax.experimental import pallas as pl
from jax.experimental.pallas import tpu as pltpu


# ----------------------------------------------------------------------------
# Kernel 1: hoisted input projection, all timesteps at once, per-gate outputs.
#   feat: (M, F) with M = T*B;  w: (4, F, H);  b: (4, 1, H)
#   outputs: 4 x (M, H)   (gate order i, f, g, o)
# ----------------------------------------------------------------------------
def _input_proj_kernel(x_ref, w_ref, b_ref, gi_ref, gf_ref, gg_ref, go_ref):
    x = x_ref[...]
    gi_ref[...] = jnp.dot(x, w_ref[0], preferred_element_type=jnp.float32) + b_ref[0]
    gf_ref[...] = jnp.dot(x, w_ref[1], preferred_element_type=jnp.float32) + b_ref[1]
    gg_ref[...] = jnp.dot(x, w_ref[2], preferred_element_type=jnp.float32) + b_ref[2]
    go_ref[...] = jnp.dot(x, w_ref[3], preferred_element_type=jnp.float32) + b_ref[3]


def input_projection(feat, w_ih, bias):
    """feat: (M, F). w_ih: (4, F, H). bias: (4, 1, H). Returns 4 x (M, H)."""
    M = feat.shape[0]
    H = w_ih.shape[2]
    out = jax.ShapeDtypeStruct((M, H), jnp.float32)
    # Everything fits in VMEM at these shapes; for large T*B tile M into
    # 256-row blocks (v6e/v7x MXU-friendly) with a row grid.
    return pl.pallas_call(
        _input_proj_kernel,
        out_shape=(out, out, out, out),
    )(feat, w_ih, bias)


# ----------------------------------------------------------------------------
# Kernel 2: LSTM recurrence for an intermediate layer.
#   Per grid step: one time-chunk of pre-activations is resident in VMEM;
#   the time loop runs in-kernel; h/c state persists in VMEM scratch across
#   chunks; the full hidden sequence of the chunk is written back once.
# ----------------------------------------------------------------------------
def _recurrence_step(t, gi_ref, gf_ref, gg_ref, go_ref, whh_ref, h_st, c_st):
    h_prev = h_st[...]
    c_prev = c_st[...]
    i_g = jax.nn.sigmoid(
        gi_ref[t] + jnp.dot(h_prev, whh_ref[0], preferred_element_type=jnp.float32))
    f_g = jax.nn.sigmoid(
        gf_ref[t] + jnp.dot(h_prev, whh_ref[1], preferred_element_type=jnp.float32))
    g_g = jnp.tanh(
        gg_ref[t] + jnp.dot(h_prev, whh_ref[2], preferred_element_type=jnp.float32))
    o_g = jax.nn.sigmoid(
        go_ref[t] + jnp.dot(h_prev, whh_ref[3], preferred_element_type=jnp.float32))
    c_new = f_g * c_prev + i_g * g_g
    h_new = o_g * jnp.tanh(c_new)
    c_st[...] = c_new
    h_st[...] = h_new
    return h_new


def _lstm_recurrence_kernel(gi_ref, gf_ref, gg_ref, go_ref, whh_ref,
                            hseq_ref, h_st, c_st, *, chunk):
    @pl.when(pl.program_id(0) == 0)
    def _():
        h_st[...] = jnp.zeros_like(h_st)
        c_st[...] = jnp.zeros_like(c_st)

    @pl.loop(0, chunk)
    def _(t):
        h_new = _recurrence_step(t, gi_ref, gf_ref, gg_ref, go_ref,
                                 whh_ref, h_st, c_st)
        hseq_ref[t] = h_new


def lstm_recurrence(gi, gf, gg, go, w_hh, *, chunk):
    """gi/gf/gg/go: (T, B, H) gate pre-activations. w_hh: (4, H, H).
    Returns hidden sequence (T, B, H)."""
    T, B, H = gi.shape
    nchunks = T // chunk
    kernel = functools.partial(_lstm_recurrence_kernel, chunk=chunk)
    gate_spec = pl.BlockSpec((chunk, B, H), lambda c: (c, 0, 0))
    return pl.pallas_call(
        kernel,
        out_shape=jax.ShapeDtypeStruct((T, B, H), jnp.float32),
        grid_spec=pltpu.PrefetchScalarGridSpec(
            num_scalar_prefetch=0,
            grid=(nchunks,),
            in_specs=[gate_spec, gate_spec, gate_spec, gate_spec,
                      pl.BlockSpec((4, H, H), lambda c: (0, 0, 0))],
            out_specs=gate_spec,
            scratch_shapes=[pltpu.VMEM((B, H), jnp.float32),   # h state
                            pltpu.VMEM((B, H), jnp.float32)],  # c state
        ),
        compiler_params=pltpu.CompilerParams(
            dimension_semantics=("arbitrary",)),
    )(gi, gf, gg, go, w_hh)


# ----------------------------------------------------------------------------
# Kernel 3: final LSTM layer fused with the head.
#   No per-timestep HBM writes; only the last hidden state is used, and
#   BatchNorm(eval) -> ReLU -> Linear is applied in-kernel on the last chunk.
# ----------------------------------------------------------------------------
def _lstm_final_head_kernel(gi_ref, gf_ref, gg_ref, go_ref, whh_ref,
                            gamma_ref, beta_ref, mean_ref, var_ref,
                            fcw_ref, fcb_ref, out_ref, h_st, c_st, *, chunk):
    @pl.when(pl.program_id(0) == 0)
    def _():
        h_st[...] = jnp.zeros_like(h_st)
        c_st[...] = jnp.zeros_like(c_st)

    @pl.loop(0, chunk)
    def _(t):
        _recurrence_step(t, gi_ref, gf_ref, gg_ref, go_ref, whh_ref, h_st, c_st)

    @pl.when(pl.program_id(0) == pl.num_programs(0) - 1)
    def _():
        eps = 1e-5
        h = h_st[...]                                   # last hidden state (B, H)
        inv_std = jax.lax.rsqrt(var_ref[...] + eps)     # (1, H)
        y = (h - mean_ref[...]) * inv_std * gamma_ref[...] + beta_ref[...]
        y = jnp.maximum(y, 0.0)                         # ReLU
        out_ref[...] = (jnp.dot(y, fcw_ref[...],
                                preferred_element_type=jnp.float32)
                        + fcb_ref[...])


def lstm_final_head(gi, gf, gg, go, w_hh, gamma, beta, mean, var,
                    fc_w_t, fc_b, *, chunk):
    T, B, H = gi.shape
    O = fc_w_t.shape[1]
    nchunks = T // chunk
    kernel = functools.partial(_lstm_final_head_kernel, chunk=chunk)
    gate_spec = pl.BlockSpec((chunk, B, H), lambda c: (c, 0, 0))
    vec_spec = pl.BlockSpec((1, H), lambda c: (0, 0))
    return pl.pallas_call(
        kernel,
        out_shape=jax.ShapeDtypeStruct((B, O), jnp.float32),
        grid_spec=pltpu.PrefetchScalarGridSpec(
            num_scalar_prefetch=0,
            grid=(nchunks,),
            in_specs=[gate_spec, gate_spec, gate_spec, gate_spec,
                      pl.BlockSpec((4, H, H), lambda c: (0, 0, 0)),
                      vec_spec, vec_spec, vec_spec, vec_spec,
                      pl.BlockSpec((H, O), lambda c: (0, 0)),
                      pl.BlockSpec((1, O), lambda c: (0, 0))],
            out_specs=pl.BlockSpec((B, O), lambda c: (0, 0)),
            scratch_shapes=[pltpu.VMEM((B, H), jnp.float32),   # h state
                            pltpu.VMEM((B, H), jnp.float32)],  # c state
        ),
        compiler_params=pltpu.CompilerParams(
            dimension_semantics=("arbitrary",)),
    )(gi, gf, gg, go, w_hh, gamma, beta, mean, var, fc_w_t, fc_b)


# ----------------------------------------------------------------------------
# Parameters (PyTorch layout -> per-gate TPU-friendly layout)
# ----------------------------------------------------------------------------
def init_params(key, input_size, hidden_size, num_layers, output_size):
    H = hidden_size
    bound = 1.0 / math.sqrt(H)
    params = {"layers": []}
    for l in range(num_layers):
        in_sz = input_size if l == 0 else H
        key, k1, k2, k3, k4 = jax.random.split(key, 5)
        w_ih = jax.random.uniform(k1, (4 * H, in_sz), jnp.float32, -bound, bound)
        w_hh = jax.random.uniform(k2, (4 * H, H), jnp.float32, -bound, bound)
        b_ih = jax.random.uniform(k3, (4 * H,), jnp.float32, -bound, bound)
        b_hh = jax.random.uniform(k4, (4 * H,), jnp.float32, -bound, bound)
        params["layers"].append({
            # per-gate layouts (gate order [i, f, g, o]); avoids lane slicing
            "w_ih": w_ih.reshape(4, H, in_sz).transpose(0, 2, 1),  # (4, in, H)
            "w_hh": w_hh.reshape(4, H, H).transpose(0, 2, 1),      # (4, H, H)
            "bias": (b_ih + b_hh).reshape(4, 1, H),                # (4, 1, H)
        })
    # BatchNorm1d(hidden_size): eval-mode running stats + affine params
    params["bn_gamma"] = jnp.ones((1, H), jnp.float32)
    params["bn_beta"] = jnp.zeros((1, H), jnp.float32)
    params["bn_mean"] = jnp.zeros((1, H), jnp.float32)
    params["bn_var"] = jnp.ones((1, H), jnp.float32)
    # Linear(hidden_size, output_size)
    key, k5, k6 = jax.random.split(key, 3)
    fc_w = jax.random.uniform(k5, (output_size, H), jnp.float32, -bound, bound)
    fc_b = jax.random.uniform(k6, (output_size,), jnp.float32, -bound, bound)
    params["fc_w_t"] = fc_w.T                                      # (H, O)
    params["fc_b"] = fc_b.reshape(1, output_size)
    return params


# ----------------------------------------------------------------------------
# Forward pass
# ----------------------------------------------------------------------------
def lstm_model_forward(params, x, *, time_chunk=None):
    """x: (B, T, I) float32 (batch_first) -> (B, output_size)."""
    B, T, I = x.shape
    H = params["bn_gamma"].shape[1]
    chunk = T if time_chunk is None else time_chunk
    assert T % chunk == 0, "time_chunk must divide the sequence length"

    n_layers = len(params["layers"])
    feat = jnp.transpose(x, (1, 0, 2)).reshape(T * B, I)   # time-major, flat rows
    out = None
    for l, lp in enumerate(params["layers"]):
        # Hoisted input projection: one batched matmul over all T*B rows.
        gi, gf, gg, go = input_projection(feat, lp["w_ih"], lp["bias"])
        gi = gi.reshape(T, B, H)
        gf = gf.reshape(T, B, H)
        gg = gg.reshape(T, B, H)
        go = go.reshape(T, B, H)
        if l < n_layers - 1:
            hseq = lstm_recurrence(gi, gf, gg, go, lp["w_hh"], chunk=chunk)
            # TODO(synk): inter-layer LSTM dropout omitted (identity in eval mode).
            feat = hseq.reshape(T * B, H)
        else:
            # Post-LSTM Dropout is identity in eval mode.
            out = lstm_final_head(gi, gf, gg, go, lp["w_hh"],
                                  params["bn_gamma"], params["bn_beta"],
                                  params["bn_mean"], params["bn_var"],
                                  params["fc_w_t"], params["fc_b"],
                                  chunk=chunk)
    return out


# ----------------------------------------------------------------------------
# Pure-JAX reference (same math, no Pallas) for correctness checking.
# ----------------------------------------------------------------------------
def lstm_model_reference(params, x):
    B, T, _ = x.shape
    H = params["bn_gamma"].shape[1]
    feat = jnp.transpose(x, (1, 0, 2))  # (T, B, in)
    for lp in params["layers"]:
        w_ih, w_hh, bias = lp["w_ih"], lp["w_hh"], lp["bias"]
        h = jnp.zeros((B, H), jnp.float32)
        c = jnp.zeros((B, H), jnp.float32)
        hs = []
        for t in range(T):
            x_t = feat[t]
            i_g = jax.nn.sigmoid(x_t @ w_ih[0] + h @ w_hh[0] + bias[0])
            f_g = jax.nn.sigmoid(x_t @ w_ih[1] + h @ w_hh[1] + bias[1])
            g_g = jnp.tanh(x_t @ w_ih[2] + h @ w_hh[2] + bias[2])
            o_g = jax.nn.sigmoid(x_t @ w_ih[3] + h @ w_hh[3] + bias[3])
            c = f_g * c + i_g * g_g
            h = o_g * jnp.tanh(c)
            hs.append(h)
        feat = jnp.stack(hs, axis=0)
    h_last = feat[-1]
    y = ((h_last - params["bn_mean"]) * jax.lax.rsqrt(params["bn_var"] + 1e-5)
         * params["bn_gamma"] + params["bn_beta"])
    y = jnp.maximum(y, 0.0)
    return y @ params["fc_w_t"] + params["fc_b"]


if __name__ == "__main__":
    input_size = 16
    hidden_size = 32
    num_layers = 2
    output_size = 8
    batch = 4
    seq = 8

    key = jax.random.PRNGKey(0)
    kp, kx = jax.random.split(key)
    params = init_params(kp, input_size, hidden_size, num_layers, output_size)
    x = jax.random.normal(kx, (batch, seq, input_size), jnp.float32)

    fwd = jax.jit(functools.partial(lstm_model_forward, time_chunk=4))
    out = jax.block_until_ready(fwd(params, x))

    assert out.shape == (batch, output_size), out.shape
    assert bool(jnp.all(jnp.isfinite(out)))

    ref = lstm_model_reference(params, x)
    max_err = float(jnp.max(jnp.abs(out - ref)))
    assert jnp.allclose(out, ref, atol=1e-4, rtol=1e-4), max_err

    print("KERNEL_OK")
</pallas_src>

<mosaic_0001>
module attributes {stable_mosaic.version = 11 : i64} {
  func.func @_input_proj_kernel(%arg0: memref<32x32xf32, #tpu.memory_space<vmem>>, %arg1: memref<4x32x32xf32, #tpu.memory_space<vmem>>, %arg2: memref<4x1x32xf32, #tpu.memory_space<vmem>>, %arg3: memref<32x32xf32, #tpu.memory_space<vmem>>, %arg4: memref<32x32xf32, #tpu.memory_space<vmem>>, %arg5: memref<32x32xf32, #tpu.memory_space<vmem>>, %arg6: memref<32x32xf32, #tpu.memory_space<vmem>>) attributes {dimension_semantics = [], scalar_prefetch = 0 : i64, scratch_operands = 0 : i64, tpu.core_type = #tpu.core_type<tc>} {
    %c0 = arith.constant 0 : index
    %c0_0 = arith.constant 0 : index
    %0 = vector.load %arg0[%c0, %c0_0] : memref<32x32xf32, #tpu.memory_space<vmem>>, vector<32x32xf32>
    %c0_1 = arith.constant 0 : index
    %c0_2 = arith.constant 0 : index
    %c0_3 = arith.constant 0 : index
    %1 = vector.load %arg1[%c0_1, %c0_2, %c0_3] : memref<4x32x32xf32, #tpu.memory_space<vmem>>, vector<1x32x32xf32>
    %2 = vector.shape_cast %1 : vector<1x32x32xf32> to vector<32x32xf32>
    %cst = arith.constant dense<0.000000e+00> : vector<32x32xf32>
    %3 = tpu.matmul %0, %2, %cst {dimension_numbers = #tpu.dot_dimension_numbers<[1], [0], [0], [1], [0, 0, 1, 1], [], []>} : vector<32x32xf32>, vector<32x32xf32>, vector<32x32xf32> -> vector<32x32xf32>
    %c0_4 = arith.constant 0 : index
    %c0_5 = arith.constant 0 : index
    %c0_6 = arith.constant 0 : index
    %4 = vector.load %arg2[%c0_4, %c0_5, %c0_6] : memref<4x1x32xf32, #tpu.memory_space<vmem>>, vector<1x1x32xf32>
    %5 = vector.shape_cast %4 : vector<1x1x32xf32> to vector<1x32xf32>
    %6 = vector.broadcast %5 : vector<1x32xf32> to vector<32x32xf32>
    %7 = arith.addf %3, %6 : vector<32x32xf32>
    %c0_7 = arith.constant 0 : index
    %c0_8 = arith.constant 0 : index
    %8 = vector.load %arg3[%c0_7, %c0_8] : memref<32x32xf32, #tpu.memory_space<vmem>>, vector<32x32xf32>
    tpu.vector_store %arg3[%c0_7, %c0_8], %7 {strides = array<i32>} : memref<32x32xf32, #tpu.memory_space<vmem>>, vector<32x32xf32>,
    %c1 = arith.constant 1 : index
    %c0_9 = arith.constant 0 : index
    %c0_10 = arith.constant 0 : index
    %9 = vector.load %arg1[%c1, %c0_9, %c0_10] : memref<4x32x32xf32, #tpu.memory_space<vmem>>, vector<1x32x32xf32>
    %10 = vector.shape_cast %9 : vector<1x32x32xf32> to vector<32x32xf32>
    %cst_11 = arith.constant dense<0.000000e+00> : vector<32x32xf32>
    %11 = tpu.matmul %0, %10, %cst_11 {dimension_numbers = #tpu.dot_dimension_numbers<[1], [0], [0], [1], [0, 0, 1, 1], [], []>} : vector<32x32xf32>, vector<32x32xf32>, vector<32x32xf32> -> vector<32x32xf32>
    %c1_12 = arith.constant 1 : index
    %c0_13 = arith.constant 0 : index
    %c0_14 = arith.constant 0 : index
    %12 = vector.load %arg2[%c1_12, %c0_13, %c0_14] : memref<4x1x32xf32, #tpu.memory_space<vmem>>, vector<1x1x32xf32>
    %13 = vector.shape_cast %12 : vector<1x1x32xf32> to vector<1x32xf32>
    %14 = vector.broadcast %13 : vector<1x32xf32> to vector<32x32xf32>
    %15 = arith.addf %11, %14 : vector<32x32xf32>
    %c0_15 = arith.constant 0 : index
    %c0_16 = arith.constant 0 : index
    %16 = vector.load %arg4[%c0_15, %c0_16] : memref<32x32xf32, #tpu.memory_space<vmem>>, vector<32x32xf32>
    tpu.vector_store %arg4[%c0_15, %c0_16], %15 {strides = array<i32>} : memref<32x32xf32, #tpu.memory_space<vmem>>, vector<32x32xf32>,
    %c2 = arith.constant 2 : index
    %c0_17 = arith.constant 0 : index
    %c0_18 = arith.constant 0 : index
    %17 = vector.load %arg1[%c2, %c0_17, %c0_18] : memref<4x32x32xf32, #tpu.memory_space<vmem>>, vector<1x32x32xf32>
    %18 = vector.shape_cast %17 : vector<1x32x32xf32> to vector<32x32xf32>
    %cst_19 = arith.constant dense<0.000000e+00> : vector<32x32xf32>
    %19 = tpu.matmul %0, %18, %cst_19 {dimension_numbers = #tpu.dot_dimension_numbers<[1], [0], [0], [1], [0, 0, 1, 1], [], []>} : vector<32x32xf32>, vector<32x32xf32>, vector<32x32xf32> -> vector<32x32xf32>
    %c2_20 = arith.constant 2 : index
    %c0_21 = arith.constant 0 : index
    %c0_22 = arith.constant 0 : index
    %20 = vector.load %arg2[%c2_20, %c0_21, %c0_22] : memref<4x1x32xf32, #tpu.memory_space<vmem>>, vector<1x1x32xf32>
    %21 = vector.shape_cast %20 : vector<1x1x32xf32> to vector<1x32xf32>
    %22 = vector.broadcast %21 : vector<1x32xf32> to vector<32x32xf32>
    %23 = arith.addf %19, %22 : vector<32x32xf32>
    %c0_23 = arith.constant 0 : index
    %c0_24 = arith.constant 0 : index
    %24 = vector.load %arg5[%c0_23, %c0_24] : memref<32x32xf32, #tpu.memory_space<vmem>>, vector<32x32xf32>
    tpu.vector_store %arg5[%c0_23, %c0_24], %23 {strides = array<i32>} : memref<32x32xf32, #tpu.memory_space<vmem>>, vector<32x32xf32>,
    %c3 = arith.constant 3 : index
    %c0_25 = arith.constant 0 : index
    %c0_26 = arith.constant 0 : index
    %25 = vector.load %arg1[%c3, %c0_25, %c0_26] : memref<4x32x32xf32, #tpu.memory_space<vmem>>, vector<1x32x32xf32>
    %26 = vector.shape_cast %25 : vector<1x32x32xf32> to vector<32x32xf32>
    %cst_27 = arith.constant dense<0.000000e+00> : vector<32x32xf32>
    %27 = tpu.matmul %0, %26, %cst_27 {dimension_numbers = #tpu.dot_dimension_numbers<[1], [0], [0], [1], [0, 0, 1, 1], [], []>} : vector<32x32xf32>, vector<32x32xf32>, vector<32x32xf32> -> vector<32x32xf32>
    %c3_28 = arith.constant 3 : index
    %c0_29 = arith.constant 0 : index
    %c0_30 = arith.constant 0 : index
    %28 = vector.load %arg2[%c3_28, %c0_29, %c0_30] : memref<4x1x32xf32, #tpu.memory_space<vmem>>, vector<1x1x32xf32>
    %29 = vector.shape_cast %28 : vector<1x1x32xf32> to vector<1x32xf32>
    %30 = vector.broadcast %29 : vector<1x32xf32> to vector<32x32xf32>
    %31 = arith.addf %27, %30 : vector<32x32xf32>
    %c0_31 = arith.constant 0 : index
    %c0_32 = arith.constant 0 : index
    %32 = vector.load %arg6[%c0_31, %c0_32] : memref<32x32xf32, #tpu.memory_space<vmem>>, vector<32x32xf32>
    tpu.vector_store %arg6[%c0_31, %c0_32], %31 {strides = array<i32>} : memref<32x32xf32, #tpu.memory_space<vmem>>, vector<32x32xf32>,
    return
  }
}

module attributes {stable_mosaic.version = 11 : i64} {
  func.func @_input_proj_kernel(%arg0: memref<32x16xf32, #tpu.memory_space<vmem>>, %arg1: memref<4x16x32xf32, #tpu.memory_space<vmem>>, %arg2: memref<4x1x32xf32, #tpu.memory_space<vmem>>, %arg3: memref<32x32xf32, #tpu.memory_space<vmem>>, %arg4: memref<32x32xf32, #tpu.memory_space<vmem>>, %arg5: memref<32x32xf32, #tpu.memory_space<vmem>>, %arg6: memref<32x32xf32, #tpu.memory_space<vmem>>) attributes {dimension_semantics = [], scalar_prefetch = 0 : i64, scratch_operands = 0 : i64, tpu.core_type = #tpu.core_type<tc>} {
    %c0 = arith.constant 0 : index
    %c0_0 = arith.constant 0 : index
    %0 = vector.load %arg0[%c0, %c0_0] : memref<32x16xf32, #tpu.memory_space<vmem>>, vector<32x16xf32>
    %c0_1 = arith.constant 0 : index
    %c0_2 = arith.constant 0 : index
    %c0_3 = arith.constant 0 : index
    %1 = vector.load %arg1[%c0_1, %c0_2, %c0_3] : memref<4x16x32xf32, #tpu.memory_space<vmem>>, vector<1x16x32xf32>
    %2 = vector.shape_cast %1 : vector<1x16x32xf32> to vector<16x32xf32>
    %cst = arith.constant dense<0.000000e+00> : vector<32x32xf32>
    %3 = tpu.matmul %0, %2, %cst {dimension_numbers = #tpu.dot_dimension_numbers<[1], [0], [0], [1], [0, 0, 1, 1], [], []>} : vector<32x16xf32>, vector<16x32xf32>, vector<32x32xf32> -> vector<32x32xf32>
    %c0_4 = arith.constant 0 : index
    %c0_5 = arith.constant 0 : index
    %c0_6 = arith.constant 0 : index
    %4 = vector.load %arg2[%c0_4, %c0_5, %c0_6] : memref<4x1x32xf32, #tpu.memory_space<vmem>>, vector<1x1x32xf32>
    %5 = vector.shape_cast %4 : vector<1x1x32xf32> to vector<1x32xf32>
    %6 = vector.broadcast %5 : vector<1x32xf32> to vector<32x32xf32>
    %7 = arith.addf %3, %6 : vector<32x32xf32>
    %c0_7 = arith.constant 0 : index
    %c0_8 = arith.constant 0 : index
    %8 = vector.load %arg3[%c0_7, %c0_8] : memref<32x32xf32, #tpu.memory_space<vmem>>, vector<32x32xf32>
    tpu.vector_store %arg3[%c0_7, %c0_8], %7 {strides = array<i32>} : memref<32x32xf32, #tpu.memory_space<vmem>>, vector<32x32xf32>,
    %c1 = arith.constant 1 : index
    %c0_9 = arith.constant 0 : index
    %c0_10 = arith.constant 0 : index
    %9 = vector.load %arg1[%c1, %c0_9, %c0_10] : memref<4x16x32xf32, #tpu.memory_space<vmem>>, vector<1x16x32xf32>
    %10 = vector.shape_cast %9 : vector<1x16x32xf32> to vector<16x32xf32>
    %cst_11 = arith.constant dense<0.000000e+00> : vector<32x32xf32>
    %11 = tpu.matmul %0, %10, %cst_11 {dimension_numbers = #tpu.dot_dimension_numbers<[1], [0], [0], [1], [0, 0, 1, 1], [], []>} : vector<32x16xf32>, vector<16x32xf32>, vector<32x32xf32> -> vector<32x32xf32>
    %c1_12 = arith.constant 1 : index
    %c0_13 = arith.constant 0 : index
    %c0_14 = arith.constant 0 : index
    %12 = vector.load %arg2[%c1_12, %c0_13, %c0_14] : memref<4x1x32xf32, #tpu.memory_space<vmem>>, vector<1x1x32xf32>
    %13 = vector.shape_cast %12 : vector<1x1x32xf32> to vector<1x32xf32>
    %14 = vector.broadcast %13 : vector<1x32xf32> to vector<32x32xf32>
    %15 = arith.addf %11, %14 : vector<32x32xf32>
    %c0_15 = arith.constant 0 : index
    %c0_16 = arith.constant 0 : index
    %16 = vector.load %arg4[%c0_15, %c0_16] : memref<32x32xf32, #tpu.memory_space<vmem>>, vector<32x32xf32>
    tpu.vector_store %arg4[%c0_15, %c0_16], %15 {strides = array<i32>} : memref<32x32xf32, #tpu.memory_space<vmem>>, vector<32x32xf32>,
    %c2 = arith.constant 2 : index
    %c0_17 = arith.constant 0 : index
    %c0_18 = arith.constant 0 : index
    %17 = vector.load %arg1[%c2, %c0_17, %c0_18] : memref<4x16x32xf32, #tpu.memory_space<vmem>>, vector<1x16x32xf32>
    %18 = vector.shape_cast %17 : vector<1x16x32xf32> to vector<16x32xf32>
    %cst_19 = arith.constant dense<0.000000e+00> : vector<32x32xf32>
    %19 = tpu.matmul %0, %18, %cst_19 {dimension_numbers = #tpu.dot_dimension_numbers<[1], [0], [0], [1], [0, 0, 1, 1], [], []>} : vector<32x16xf32>, vector<16x32xf32>, vector<32x32xf32> -> vector<32x32xf32>
    %c2_20 = arith.constant 2 : index
    %c0_21 = arith.constant 0 : index
    %c0_22 = arith.constant 0 : index
    %20 = vector.load %arg2[%c2_20, %c0_21, %c0_22] : memref<4x1x32xf32, #tpu.memory_space<vmem>>, vector<1x1x32xf32>
    %21 = vector.shape_cast %20 : vector<1x1x32xf32> to vector<1x32xf32>
    %22 = vector.broadcast %21 : vector<1x32xf32> to vector<32x32xf32>
    %23 = arith.addf %19, %22 : vector<32x32xf32>
    %c0_23 = arith.constant 0 : index
    %c0_24 = arith.constant 0 : index
    %24 = vector.load %arg5[%c0_23, %c0_24] : memref<32x32xf32, #tpu.memory_space<vmem>>, vector<32x32xf32>
    tpu.vector_store %arg5[%c0_23, %c0_24], %23 {strides = array<i32>} : memref<32x32xf32, #tpu.memory_space<vmem>>, vector<32x32xf32>,
    %c3 = arith.constant 3 : index
    %c0_25 = arith.constant 0 : index
    %c0_26 = arith.constant 0 : index
    %25 = vector.load %arg1[%c3, %c0_25, %c0_26] : memref<4x16x32xf32, #tpu.memory_space<vmem>>, vector<1x16x32xf32>
    %26 = vector.shape_cast %25 : vector<1x16x32xf32> to vector<16x32xf32>
    %cst_27 = arith.constant dense<0.000000e+00> : vector<32x32xf32>
    %27 = tpu.matmul %0, %26, %cst_27 {dimension_numbers = #tpu.dot_dimension_numbers<[1], [0], [0], [1], [0, 0, 1, 1], [], []>} : vector<32x16xf32>, vector<16x32xf32>, vector<32x32xf32> -> vector<32x32xf32>
    %c3_28 = arith.constant 3 : index
    %c0_29 = arith.constant 0 : index
    %c0_30 = arith.constant 0 : index
    %28 = vector.load %arg2[%c3_28, %c0_29, %c0_30] : memref<4x1x32xf32, #tpu.memory_space<vmem>>, vector<1x1x32xf32>
    %29 = vector.shape_cast %28 : vector<1x1x32xf32> to vector<1x32xf32>
    %30 = vector.broadcast %29 : vector<1x32xf32> to vector<32x32xf32>
    %31 = arith.addf %27, %30 : vector<32x32xf32>
    %c0_31 = arith.constant 0 : index
    %c0_32 = arith.constant 0 : index
    %32 = vector.load %arg6[%c0_31, %c0_32] : memref<32x32xf32, #tpu.memory_space<vmem>>, vector<32x32xf32>
    tpu.vector_store %arg6[%c0_31, %c0_32], %31 {strides = array<i32>} : memref<32x32xf32, #tpu.memory_space<vmem>>, vector<32x32xf32>,
    return
  }
}

module attributes {stable_mosaic.version = 11 : i64} {
  func.func @_lstm_recurrence_kernel(%arg0: i32, %arg1: memref<4x4x32xf32, #tpu.memory_space<vmem>>, %arg2: memref<4x4x32xf32, #tpu.memory_space<vmem>>, %arg3: memref<4x4x32xf32, #tpu.memory_space<vmem>>, %arg4: memref<4x4x32xf32, #tpu.memory_space<vmem>>, %arg5: memref<4x32x32xf32, #tpu.memory_space<vmem>>, %arg6: memref<4x4x32xf32, #tpu.memory_space<vmem>>, %arg7: memref<4x32xf32, #tpu.memory_space<vmem>>, %arg8: memref<4x32xf32, #tpu.memory_space<vmem>>) attributes {dimension_semantics = [#tpu.dimension_semantics<arbitrary>], iteration_bounds = array<i64: 2>, scalar_prefetch = 0 : i64, scratch_operands = 2 : i64, tpu.core_type = #tpu.core_type<tc>, window_params = [{transform_indices = @transform_0, window_bounds = array<i64: 4, 4, 32>}, {transform_indices = @transform_1, window_bounds = array<i64: 4, 4, 32>}, {transform_indices = @transform_2, window_bounds = array<i64: 4, 4, 32>}, {transform_indices = @transform_3, window_bounds = array<i64: 4, 4, 32>}, {pipeline_mode = #tpu.pipeline_mode<synchronous>, transform_indices = @transform_4, window_bounds = array<i64: 4, 32, 32>}, {transform_indices = @transform_5, window_bounds = array<i64: 4, 4, 32>}]} {
    %c0_i32 = arith.constant 0 : i32
    %0 = arith.cmpi eq, %arg0, %c0_i32 : i32
    %1 = arith.extui %0 : i1 to i32
    %c0_i32_0 = arith.constant 0 : i32
    %2 = arith.cmpi ne, %1, %c0_i32_0 : i32
    scf.if %2 {
      %cst = arith.constant 0.000000e+00 : f32
      %4 = vector.broadcast %cst : f32 to vector<4x32xf32>
      %c0 = arith.constant 0 : index
      %c0_3 = arith.constant 0 : index
      %5 = vector.load %arg7[%c0, %c0_3] : memref<4x32xf32, #tpu.memory_space<vmem>>, vector<4x32xf32>
      tpu.vector_store %arg7[%c0, %c0_3], %4 {strides = array<i32>} : memref<4x32xf32, #tpu.memory_space<vmem>>, vector<4x32xf32>,
      %cst_4 = arith.constant 0.000000e+00 : f32
      %6 = vector.broadcast %cst_4 : f32 to vector<4x32xf32>
      %c0_5 = arith.constant 0 : index
      %c0_6 = arith.constant 0 : index
      %7 = vector.load %arg8[%c0_5, %c0_6] : memref<4x32xf32, #tpu.memory_space<vmem>>, vector<4x32xf32>
      tpu.vector_store %arg8[%c0_5, %c0_6], %6 {strides = array<i32>} : memref<4x32xf32, #tpu.memory_space<vmem>>, vector<4x32xf32>,
    } else {
    }
    %c0_i32_1 = arith.constant 0 : i32
    %c4_i32 = arith.constant 4 : i32
    %3 = arith.addi %c0_i32_1, %c4_i32 : i32
    %c1_i32 = arith.constant 1 : i32
    scf.for %arg9 = %c0_i32_1 to %3 step %c1_i32  : i32 {
      %c1_i32_3 = arith.constant 1 : i32
      %4 = arith.muli %arg9, %c1_i32_3 : i32
      %c0_i32_4 = arith.constant 0 : i32
      %5 = arith.addi %c0_i32_4, %4 : i32
      %c0 = arith.constant 0 : index
      %c0_5 = arith.constant 0 : index
      %6 = vector.load %arg7[%c0, %c0_5] : memref<4x32xf32, #tpu.memory_space<vmem>>, vector<4x32xf32>
      %c0_6 = arith.constant 0 : index
      %c0_7 = arith.constant 0 : index
      %7 = vector.load %arg8[%c0_6, %c0_7] : memref<4x32xf32, #tpu.memory_space<vmem>>, vector<4x32xf32>
      %8 = arith.index_cast %5 : i32 to index
      %c0_8 = arith.constant 0 : index
      %c0_9 = arith.constant 0 : index
      %9 = vector.load %arg1[%8, %c0_8, %c0_9] : memref<4x4x32xf32, #tpu.memory_space<vmem>>, vector<1x4x32xf32>
      %10 = vector.shape_cast %9 : vector<1x4x32xf32> to vector<4x32xf32>
      %c0_10 = arith.constant 0 : index
      %c0_11 = arith.constant 0 : index
      %c0_12 = arith.constant 0 : index
      %11 = vector.load %arg5[%c0_10, %c0_11, %c0_12] : memref<4x32x32xf32, #tpu.memory_space<vmem>>, vector<1x32x32xf32>
      %12 = vector.shape_cast %11 : vector<1x32x32xf32> to vector<32x32xf32>
      %cst = arith.constant dense<0.000000e+00> : vector<4x32xf32>
      %13 = tpu.matmul %6, %12, %cst {dimension_numbers = #tpu.dot_dimension_numbers<[1], [0], [0], [1], [0, 0, 1, 1], [], []>} : vector<4x32xf32>, vector<32x32xf32>, vector<4x32xf32> -> vector<4x32xf32>
      %14 = arith.addf %10, %13 : vector<4x32xf32>
      %15 = arith.negf %14 : vector<4x32xf32>
      %16 = math.exp %15 : vector<4x32xf32>
      %cst_13 = arith.constant 1.000000e+00 : f32
      %17 = vector.broadcast %cst_13 : f32 to vector<4x32xf32>
      %18 = arith.addf %17, %16 : vector<4x32xf32>
      %19 = arith.divf %17, %18 : vector<4x32xf32>
      %20 = arith.index_cast %5 : i32 to index
      %c0_14 = arith.constant 0 : index
      %c0_15 = arith.constant 0 : index
      %21 = vector.load %arg2[%20, %c0_14, %c0_15] : memref<4x4x32xf32, #tpu.memory_space<vmem>>, vector<1x4x32xf32>
      %22 = vector.shape_cast %21 : vector<1x4x32xf32> to vector<4x32xf32>
      %c1 = arith.constant 1 : index
      %c0_16 = arith.constant 0 : index
      %c0_17 = arith.constant 0 : index
      %23 = vector.load %arg5[%c1, %c0_16, %c0_17] : memref<4x32x32xf32, #tpu.memory_space<vmem>>, vector<1x32x32xf32>
      %24 = vector.shape_cast %23 : vector<1x32x32xf32> to vector<32x32xf32>
      %cst_18 = arith.constant dense<0.000000e+00> : vector<4x32xf32>
      %25 = tpu.matmul %6, %24, %cst_18 {dimension_numbers = #tpu.dot_dimension_numbers<[1], [0], [0], [1], [0, 0, 1, 1], [], []>} : vector<4x32xf32>, vector<32x32xf32>, vector<4x32xf32> -> vector<4x32xf32>
      %26 = arith.addf %22, %25 : vector<4x32xf32>
      %27 = arith.negf %26 : vector<4x32xf32>
      %28 = math.exp %27 : vector<4x32xf32>
      %cst_19 = arith.constant 1.000000e+00 : f32
      %29 = vector.broadcast %cst_19 : f32 to vector<4x32xf32>
      %30 = arith.addf %29, %28 : vector<4x32xf32>
      %31 = arith.divf %29, %30 : vector<4x32xf32>
      %32 = arith.index_cast %5 : i32 to index
      %c0_20 = arith.constant 0 : index
      %c0_21 = arith.constant 0 : index
      %33 = vector.load %arg3[%32, %c0_20, %c0_21] : memref<4x4x32xf32, #tpu.memory_space<vmem>>, vector<1x4x32xf32>
      %34 = vector.shape_cast %33 : vector<1x4x32xf32> to vector<4x32xf32>
      %c2 = arith.constant 2 : index
      %c0_22 = arith.constant 0 : index
      %c0_23 = arith.constant 0 : index
      %35 = vector.load %arg5[%c2, %c0_22, %c0_23] : memref<4x32x32xf32, #tpu.memory_space<vmem>>, vector<1x32x32xf32>
      %36 = vector.shape_cast %35 : vector<1x32x32xf32> to vector<32x32xf32>
      %cst_24 = arith.constant dense<0.000000e+00> : vector<4x32xf32>
      %37 = tpu.matmul %6, %36, %cst_24 {dimension_numbers = #tpu.dot_dimension_numbers<[1], [0], [0], [1], [0, 0, 1, 1], [], []>} : vector<4x32xf32>, vector<32x32xf32>, vector<4x32xf32> -> vector<4x32xf32>
      %38 = arith.addf %34, %37 : vector<4x32xf32>
      %39 = math.tanh %38 : vector<4x32xf32>
      %40 = arith.index_cast %5 : i32 to index
      %c0_25 = arith.constant 0 : index
      %c0_26 = arith.constant 0 : index
      %41 = vector.load %arg4[%40, %c0_25, %c0_26] : memref<4x4x32xf32, #tpu.memory_space<vmem>>, vector<1x4x32xf32>
      %42 = vector.shape_cast %41 : vector<1x4x32xf32> to vector<4x32xf32>
      %c3 = arith.constant 3 : index
      %c0_27 = arith.constant 0 : index
      %c0_28 = arith.constant 0 : index
      %43 = vector.load %arg5[%c3, %c0_27, %c0_28] : memref<4x32x32xf32, #tpu.memory_space<vmem>>, vector<1x32x32xf32>
      %44 = vector.shape_cast %43 : vector<1x32x32xf32> to vector<32x32xf32>
      %cst_29 = arith.constant dense<0.000000e+00> : vector<4x32xf32>
      %45 = tpu.matmul %6, %44, %cst_29 {dimension_numbers = #tpu.dot_dimension_numbers<[1], [0], [0], [1], [0, 0, 1, 1], [], []>} : vector<4x32xf32>, vector<32x32xf32>, vector<4x32xf32> -> vector<4x32xf32>
      %46 = arith.addf %42, %45 : vector<4x32xf32>
      %47 = arith.negf %46 : vector<4x32xf32>
      %48 = math.exp %47 : vector<4x32xf32>
      %cst_30 = arith.constant 1.000000e+00 : f32
      %49 = vector.broadcast %cst_30 : f32 to vector<4x32xf32>
      %50 = arith.addf %49, %48 : vector<4x32xf32>
      %51 = arith.divf %49, %50 : vector<4x32xf32>
      %52 = arith.mulf %31, %7 : vector<4x32xf32>
      %53 = arith.mulf %19, %39 : vector<4x32xf32>
      %54 = arith.addf %52, %53 : vector<4x32xf32>
      %55 = math.tanh %54 : vector<4x32xf32>
      %56 = arith.mulf %51, %55 : vector<4x32xf32>
      %c0_31 = arith.constant 0 : index
      %c0_32 = arith.constant 0 : index
      %57 = vector.load %arg8[%c0_31, %c0_32] : memref<4x32xf32, #tpu.memory_space<vmem>>, vector<4x32xf32>
      tpu.vector_store %arg8[%c0_31, %c0_32], %54 {strides = array<i32>} : memref<4x32xf32, #tpu.memory_space<vmem>>, vector<4x32xf32>,
      %c0_33 = arith.constant 0 : index
      %c0_34 = arith.constant 0 : index
      %58 = vector.load %arg7[%c0_33, %c0_34] : memref<4x32xf32, #tpu.memory_space<vmem>>, vector<4x32xf32>
      tpu.vector_store %arg7[%c0_33, %c0_34], %56 {strides = array<i32>} : memref<4x32xf32, #tpu.memory_space<vmem>>, vector<4x32xf32>,
      %59 = arith.index_cast %5 : i32 to index
      %c0_35 = arith.constant 0 : index
      %c0_36 = arith.constant 0 : index
      %60 = vector.load %arg6[%59, %c0_35, %c0_36] : memref<4x4x32xf32, #tpu.memory_space<vmem>>, vector<1x4x32xf32>
      %61 = vector.shape_cast %60 : vector<1x4x32xf32> to vector<4x32xf32>
      %62 = vector.shape_cast %56 : vector<4x32xf32> to vector<1x4x32xf32>
      tpu.vector_store %arg6[%59, %c0_35, %c0_36], %62 {strides = array<i32>} : memref<4x4x32xf32, #tpu.memory_space<vmem>>, vector<1x4x32xf32>,
    }
    %c4_i32_2 = arith.constant 4 : i32
    return
  }
  func.func @transform_0(%arg0: i32) -> (i32, i32, i32) {
    %c0_i32 = arith.constant 0 : i32
    %c0_i32_0 = arith.constant 0 : i32
    %c0_i32_1 = arith.constant 0 : i32
    return %arg0, %c0_i32, %c0_i32_0 : i32, i32, i32
  }
  func.func @transform_1(%arg0: i32) -> (i32, i32, i32) {
    %c0_i32 = arith.constant 0 : i32
    %c0_i32_0 = arith.constant 0 : i32
    %c0_i32_1 = arith.constant 0 : i32
    return %arg0, %c0_i32, %c0_i32_0 : i32, i32, i32
  }
  func.func @transform_2(%arg0: i32) -> (i32, i32, i32) {
    %c0_i32 = arith.constant 0 : i32
    %c0_i32_0 = arith.constant 0 : i32
    %c0_i32_1 = arith.constant 0 : i32
    return %arg0, %c0_i32, %c0_i32_0 : i32, i32, i32
  }
  func.func @transform_3(%arg0: i32) -> (i32, i32, i32) {
    %c0_i32 = arith.constant 0 : i32
    %c0_i32_0 = arith.constant 0 : i32
    %c0_i32_1 = arith.constant 0 : i32
    return %arg0, %c0_i32, %c0_i32_0 : i32, i32, i32
  }
  func.func @transform_4(%arg0: i32) -> (i32, i32, i32) {
    %c0_i32 = arith.constant 0 : i32
    %c0_i32_0 = arith.constant 0 : i32
    %c0_i32_1 = arith.constant 0 : i32
    %c0_i32_2 = arith.constant 0 : i32
    return %c0_i32, %c0_i32_0, %c0_i32_1 : i32, i32, i32
  }
  func.func @transform_5(%arg0: i32) -> (i32, i32, i32) {
    %c0_i32 = arith.constant 0 : i32
    %c0_i32_0 = arith.constant 0 : i32
    %c0_i32_1 = arith.constant 0 : i32
    return %arg0, %c0_i32, %c0_i32_0 : i32, i32, i32
  }
}

module attributes {stable_mosaic.version = 11 : i64} {
  func.func @_lstm_final_head_kernel(%arg0: i32, %arg1: memref<4x4x32xf32, #tpu.memory_space<vmem>>, %arg2: memref<4x4x32xf32, #tpu.memory_space<vmem>>, %arg3: memref<4x4x32xf32, #tpu.memory_space<vmem>>, %arg4: memref<4x4x32xf32, #tpu.memory_space<vmem>>, %arg5: memref<4x32x32xf32, #tpu.memory_space<vmem>>, %arg6: memref<1x32xf32, #tpu.memory_space<vmem>>, %arg7: memref<1x32xf32, #tpu.memory_space<vmem>>, %arg8: memref<1x32xf32, #tpu.memory_space<vmem>>, %arg9: memref<1x32xf32, #tpu.memory_space<vmem>>, %arg10: memref<32x8xf32, #tpu.memory_space<vmem>>, %arg11: memref<1x8xf32, #tpu.memory_space<vmem>>, %arg12: memref<4x8xf32, #tpu.memory_space<vmem>>, %arg13: memref<4x32xf32, #tpu.memory_space<vmem>>, %arg14: memref<4x32xf32, #tpu.memory_space<vmem>>) attributes {dimension_semantics = [#tpu.dimension_semantics<arbitrary>], iteration_bounds = array<i64: 2>, scalar_prefetch = 0 : i64, scratch_operands = 2 : i64, tpu.core_type = #tpu.core_type<tc>, window_params = [{transform_indices = @transform_0, window_bounds = array<i64: 4, 4, 32>}, {transform_indices = @transform_1, window_bounds = array<i64: 4, 4, 32>}, {transform_indices = @transform_2, window_bounds = array<i64: 4, 4, 32>}, {transform_indices = @transform_3, window_bounds = array<i64: 4, 4, 32>}, {pipeline_mode = #tpu.pipeline_mode<synchronous>, transform_indices = @transform_4, window_bounds = array<i64: 4, 32, 32>}, {pipeline_mode = #tpu.pipeline_mode<synchronous>, transform_indices = @transform_5, window_bounds = array<i64: 1, 32>}, {pipeline_mode = #tpu.pipeline_mode<synchronous>, transform_indices = @transform_6, window_bounds = array<i64: 1, 32>}, {pipeline_mode = #tpu.pipeline_mode<synchronous>, transform_indices = @transform_7, window_bounds = array<i64: 1, 32>}, {pipeline_mode = #tpu.pipeline_mode<synchronous>, transform_indices = @transform_8, window_bounds = array<i64: 1, 32>}, {pipeline_mode = #tpu.pipeline_mode<synchronous>, transform_indices = @transform_9, window_bounds = array<i64: 32, 8>}, {pipeline_mode = #tpu.pipeline_mode<synchronous>, transform_indices = @transform_10, window_bounds = array<i64: 1, 8>}, {pipeline_mode = #tpu.pipeline_mode<synchronous>, transform_indices = @transform_11, window_bounds = array<i64: 4, 8>}]} {
    %c0_i32 = arith.constant 0 : i32
    %0 = arith.cmpi eq, %arg0, %c0_i32 : i32
    %1 = arith.extui %0 : i1 to i32
    %c0_i32_0 = arith.constant 0 : i32
    %2 = arith.cmpi ne, %1, %c0_i32_0 : i32
    scf.if %2 {
      %cst = arith.constant 0.000000e+00 : f32
      %7 = vector.broadcast %cst : f32 to vector<4x32xf32>
      %c0 = arith.constant 0 : index
      %c0_5 = arith.constant 0 : index
      %8 = vector.load %arg13[%c0, %c0_5] : memref<4x32xf32, #tpu.memory_space<vmem>>, vector<4x32xf32>
      tpu.vector_store %arg13[%c0, %c0_5], %7 {strides = array<i32>} : memref<4x32xf32, #tpu.memory_space<vmem>>, vector<4x32xf32>,
      %cst_6 = arith.constant 0.000000e+00 : f32
      %9 = vector.broadcast %cst_6 : f32 to vector<4x32xf32>
      %c0_7 = arith.constant 0 : index
      %c0_8 = arith.constant 0 : index
      %10 = vector.load %arg14[%c0_7, %c0_8] : memref<4x32xf32, #tpu.memory_space<vmem>>, vector<4x32xf32>
      tpu.vector_store %arg14[%c0_7, %c0_8], %9 {strides = array<i32>} : memref<4x32xf32, #tpu.memory_space<vmem>>, vector<4x32xf32>,
    } else {
    }
    %c0_i32_1 = arith.constant 0 : i32
    %c4_i32 = arith.constant 4 : i32
    %3 = arith.addi %c0_i32_1, %c4_i32 : i32
    %c1_i32 = arith.constant 1 : i32
    scf.for %arg15 = %c0_i32_1 to %3 step %c1_i32  : i32 {
      %c1_i32_5 = arith.constant 1 : i32
      %7 = arith.muli %arg15, %c1_i32_5 : i32
      %c0_i32_6 = arith.constant 0 : i32
      %8 = arith.addi %c0_i32_6, %7 : i32
      %c0 = arith.constant 0 : index
      %c0_7 = arith.constant 0 : index
      %9 = vector.load %arg13[%c0, %c0_7] : memref<4x32xf32, #tpu.memory_space<vmem>>, vector<4x32xf32>
      %c0_8 = arith.constant 0 : index
      %c0_9 = arith.constant 0 : index
      %10 = vector.load %arg14[%c0_8, %c0_9] : memref<4x32xf32, #tpu.memory_space<vmem>>, vector<4x32xf32>
      %11 = arith.index_cast %8 : i32 to index
      %c0_10 = arith.constant 0 : index
      %c0_11 = arith.constant 0 : index
      %12 = vector.load %arg1[%11, %c0_10, %c0_11] : memref<4x4x32xf32, #tpu.memory_space<vmem>>, vector<1x4x32xf32>
      %13 = vector.shape_cast %12 : vector<1x4x32xf32> to vector<4x32xf32>
      %c0_12 = arith.constant 0 : index
      %c0_13 = arith.constant 0 : index
      %c0_14 = arith.constant 0 : index
      %14 = vector.load %arg5[%c0_12, %c0_13, %c0_14] : memref<4x32x32xf32, #tpu.memory_space<vmem>>, vector<1x32x32xf32>
      %15 = vector.shape_cast %14 : vector<1x32x32xf32> to vector<32x32xf32>
      %cst = arith.constant dense<0.000000e+00> : vector<4x32xf32>
      %16 = tpu.matmul %9, %15, %cst {dimension_numbers = #tpu.dot_dimension_numbers<[1], [0], [0], [1], [0, 0, 1, 1], [], []>} : vector<4x32xf32>, vector<32x32xf32>, vector<4x32xf32> -> vector<4x32xf32>
      %17 = arith.addf %13, %16 : vector<4x32xf32>
      %18 = arith.negf %17 : vector<4x32xf32>
      %19 = math.exp %18 : vector<4x32xf32>
      %cst_15 = arith.constant 1.000000e+00 : f32
      %20 = vector.broadcast %cst_15 : f32 to vector<4x32xf32>
      %21 = arith.addf %20, %19 : vector<4x32xf32>
      %22 = arith.divf %20, %21 : vector<4x32xf32>
      %23 = arith.index_cast %8 : i32 to index
      %c0_16 = arith.constant 0 : index
      %c0_17 = arith.constant 0 : index
      %24 = vector.load %arg2[%23, %c0_16, %c0_17] : memref<4x4x32xf32, #tpu.memory_space<vmem>>, vector<1x4x32xf32>
      %25 = vector.shape_cast %24 : vector<1x4x32xf32> to vector<4x32xf32>
      %c1 = arith.constant 1 : index
      %c0_18 = arith.constant 0 : index
      %c0_19 = arith.constant 0 : index
      %26 = vector.load %arg5[%c1, %c0_18, %c0_19] : memref<4x32x32xf32, #tpu.memory_space<vmem>>, vector<1x32x32xf32>
      %27 = vector.shape_cast %26 : vector<1x32x32xf32> to vector<32x32xf32>
      %cst_20 = arith.constant dense<0.000000e+00> : vector<4x32xf32>
      %28 = tpu.matmul %9, %27, %cst_20 {dimension_numbers = #tpu.dot_dimension_numbers<[1], [0], [0], [1], [0, 0, 1, 1], [], []>} : vector<4x32xf32>, vector<32x32xf32>, vector<4x32xf32> -> vector<4x32xf32>
      %29 = arith.addf %25, %28 : vector<4x32xf32>
      %30 = arith.negf %29 : vector<4x32xf32>
      %31 = math.exp %30 : vector<4x32xf32>
      %cst_21 = arith.constant 1.000000e+00 : f32
      %32 = vector.broadcast %cst_21 : f32 to vector<4x32xf32>
      %33 = arith.addf %32, %31 : vector<4x32xf32>
      %34 = arith.divf %32, %33 : vector<4x32xf32>
      %35 = arith.index_cast %8 : i32 to index
      %c0_22 = arith.constant 0 : index
      %c0_23 = arith.constant 0 : index
      %36 = vector.load %arg3[%35, %c0_22, %c0_23] : memref<4x4x32xf32, #tpu.memory_space<vmem>>, vector<1x4x32xf32>
      %37 = vector.shape_cast %36 : vector<1x4x32xf32> to vector<4x32xf32>
      %c2 = arith.constant 2 : index
      %c0_24 = arith.constant 0 : index
      %c0_25 = arith.constant 0 : index
      %38 = vector.load %arg5[%c2, %c0_24, %c0_25] : memref<4x32x32xf32, #tpu.memory_space<vmem>>, vector<1x32x32xf32>
      %39 = vector.shape_cast %38 : vector<1x32x32xf32> to vector<32x32xf32>
      %cst_26 = arith.constant dense<0.000000e+00> : vector<4x32xf32>
      %40 = tpu.matmul %9, %39, %cst_26 {dimension_numbers = #tpu.dot_dimension_numbers<[1], [0], [0], [1], [0, 0, 1, 1], [], []>} : vector<4x32xf32>, vector<32x32xf32>, vector<4x32xf32> -> vector<4x32xf32>
      %41 = arith.addf %37, %40 : vector<4x32xf32>
      %42 = math.tanh %41 : vector<4x32xf32>
      %43 = arith.index_cast %8 : i32 to index
      %c0_27 = arith.constant 0 : index
      %c0_28 = arith.constant 0 : index
      %44 = vector.load %arg4[%43, %c0_27, %c0_28] : memref<4x4x32xf32, #tpu.memory_space<vmem>>, vector<1x4x32xf32>
      %45 = vector.shape_cast %44 : vector<1x4x32xf32> to vector<4x32xf32>
      %c3 = arith.constant 3 : index
      %c0_29 = arith.constant 0 : index
      %c0_30 = arith.constant 0 : index
      %46 = vector.load %arg5[%c3, %c0_29, %c0_30] : memref<4x32x32xf32, #tpu.memory_space<vmem>>, vector<1x32x32xf32>
      %47 = vector.shape_cast %46 : vector<1x32x32xf32> to vector<32x32xf32>
      %cst_31 = arith.constant dense<0.000000e+00> : vector<4x32xf32>
      %48 = tpu.matmul %9, %47, %cst_31 {dimension_numbers = #tpu.dot_dimension_numbers<[1], [0], [0], [1], [0, 0, 1, 1], [], []>} : vector<4x32xf32>, vector<32x32xf32>, vector<4x32xf32> -> vector<4x32xf32>
      %49 = arith.addf %45, %48 : vector<4x32xf32>
      %50 = arith.negf %49 : vector<4x32xf32>
      %51 = math.exp %50 : vector<4x32xf32>
      %cst_32 = arith.constant 1.000000e+00 : f32
      %52 = vector.broadcast %cst_32 : f32 to vector<4x32xf32>
      %53 = arith.addf %52, %51 : vector<4x32xf32>
      %54 = arith.divf %52, %53 : vector<4x32xf32>
      %55 = arith.mulf %34, %10 : vector<4x32xf32>
      %56 = arith.mulf %22, %42 : vector<4x32xf32>
      %57 = arith.addf %55, %56 : vector<4x32xf32>
      %58 = math.tanh %57 : vector<4x32xf32>
      %59 = arith.mulf %54, %58 : vector<4x32xf32>
      %c0_33 = arith.constant 0 : index
      %c0_34 = arith.constant 0 : index
      %60 = vector.load %arg14[%c0_33, %c0_34] : memref<4x32xf32, #tpu.memory_space<vmem>>, vector<4x32xf32>
      tpu.vector_store %arg14[%c0_33, %c0_34], %57 {strides = array<i32>} : memref<4x32xf32, #tpu.memory_space<vmem>>, vector<4x32xf32>,
      %c0_35 = arith.constant 0 : index
      %c0_36 = arith.constant 0 : index
      %61 = vector.load %arg13[%c0_35, %c0_36] : memref<4x32xf32, #tpu.memory_space<vmem>>, vector<4x32xf32>
      tpu.vector_store %arg13[%c0_35, %c0_36], %59 {strides = array<i32>} : memref<4x32xf32, #tpu.memory_space<vmem>>, vector<4x32xf32>,
    }
    %c4_i32_2 = arith.constant 4 : i32
    %c1_i32_3 = arith.constant 1 : i32
    %4 = arith.cmpi eq, %arg0, %c1_i32_3 : i32
    %5 = arith.extui %4 : i1 to i32
    %c0_i32_4 = arith.constant 0 : i32
    %6 = arith.cmpi ne, %5, %c0_i32_4 : i32
    scf.if %6 {
      %c0 = arith.constant 0 : index
      %c0_5 = arith.constant 0 : index
      %7 = vector.load %arg13[%c0, %c0_5] : memref<4x32xf32, #tpu.memory_space<vmem>>, vector<4x32xf32>
      %c0_6 = arith.constant 0 : index
      %c0_7 = arith.constant 0 : index
      %8 = vector.load %arg9[%c0_6, %c0_7] : memref<1x32xf32, #tpu.memory_space<vmem>>, vector<1x32xf32>
      %cst = arith.constant 9.99999974E-6 : f32
      %9 = vector.broadcast %cst : f32 to vector<1x32xf32>
      %10 = arith.addf %8, %9 : vector<1x32xf32>
      %11 = math.rsqrt %10 : vector<1x32xf32>
      %c0_8 = arith.constant 0 : index
      %c0_9 = arith.constant 0 : index
      %12 = vector.load %arg8[%c0_8, %c0_9] : memref<1x32xf32, #tpu.memory_space<vmem>>, vector<1x32xf32>
      %13 = vector.broadcast %12 : vector<1x32xf32> to vector<4x32xf32>
      %14 = arith.subf %7, %13 : vector<4x32xf32>
      %15 = vector.broadcast %11 : vector<1x32xf32> to vector<4x32xf32>
      %16 = arith.mulf %14, %15 : vector<4x32xf32>
      %c0_10 = arith.constant 0 : index
      %c0_11 = arith.constant 0 : index
      %17 = vector.load %arg6[%c0_10, %c0_11] : memref<1x32xf32, #tpu.memory_space<vmem>>, vector<1x32xf32>
      %18 = vector.broadcast %17 : vector<1x32xf32> to vector<4x32xf32>
      %19 = arith.mulf %16, %18 : vector<4x32xf32>
      %c0_12 = arith.constant 0 : index
      %c0_13 = arith.constant 0 : index
      %20 = vector.load %arg7[%c0_12, %c0_13] : memref<1x32xf32, #tpu.memory_space<vmem>>, vector<1x32xf32>
      %21 = vector.broadcast %20 : vector<1x32xf32> to vector<4x32xf32>
      %22 = arith.addf %19, %21 : vector<4x32xf32>
      %cst_14 = arith.constant 0.000000e+00 : f32
      %23 = vector.broadcast %cst_14 : f32 to vector<4x32xf32>
      %24 = arith.maximumf %22, %23 : vector<4x32xf32>
      %c0_15 = arith.constant 0 : index
      %c0_16 = arith.constant 0 : index
      %25 = vector.load %arg10[%c0_15, %c0_16] : memref<32x8xf32, #tpu.memory_space<vmem>>, vector<32x8xf32>
      %cst_17 = arith.constant dense<0.000000e+00> : vector<4x8xf32>
      %26 = tpu.matmul %24, %25, %cst_17 {dimension_numbers = #tpu.dot_dimension_numbers<[1], [0], [0], [1], [0, 0, 1, 1], [], []>} : vector<4x32xf32>, vector<32x8xf32>, vector<4x8xf32> -> vector<4x8xf32>
      %c0_18 = arith.constant 0 : index
      %c0_19 = arith.constant 0 : index
      %27 = vector.load %arg11[%c0_18, %c0_19] : memref<1x8xf32, #tpu.memory_space<vmem>>, vector<1x8xf32>
      %28 = vector.broadcast %27 : vector<1x8xf32> to vector<4x8xf32>
      %29 = arith.addf %26, %28 : vector<4x8xf32>
      %c0_20 = arith.constant 0 : index
      %c0_21 = arith.constant 0 : index
      %30 = vector.load %arg12[%c0_20, %c0_21] : memref<4x8xf32, #tpu.memory_space<vmem>>, vector<4x8xf32>
      tpu.vector_store %arg12[%c0_20, %c0_21], %29 {strides = array<i32>} : memref<4x8xf32, #tpu.memory_space<vmem>>, vector<4x8xf32>,
    } else {
    }
    return
  }
  func.func @transform_0(%arg0: i32) -> (i32, i32, i32) {
    %c0_i32 = arith.constant 0 : i32
    %c0_i32_0 = arith.constant 0 : i32
    %c0_i32_1 = arith.constant 0 : i32
    return %arg0, %c0_i32, %c0_i32_0 : i32, i32, i32
  }
  func.func @transform_1(%arg0: i32) -> (i32, i32, i32) {
    %c0_i32 = arith.constant 0 : i32
    %c0_i32_0 = arith.constant 0 : i32
    %c0_i32_1 = arith.constant 0 : i32
    return %arg0, %c0_i32, %c0_i32_0 : i32, i32, i32
  }
  func.func @transform_2(%arg0: i32) -> (i32, i32, i32) {
    %c0_i32 = arith.constant 0 : i32
    %c0_i32_0 = arith.constant 0 : i32
    %c0_i32_1 = arith.constant 0 : i32
    return %arg0, %c0_i32, %c0_i32_0 : i32, i32, i32
  }
  func.func @transform_3(%arg0: i32) -> (i32, i32, i32) {
    %c0_i32 = arith.constant 0 : i32
    %c0_i32_0 = arith.constant 0 : i32
    %c0_i32_1 = arith.constant 0 : i32
    return %arg0, %c0_i32, %c0_i32_0 : i32, i32, i32
  }
  func.func @transform_4(%arg0: i32) -> (i32, i32, i32) {
    %c0_i32 = arith.constant 0 : i32
    %c0_i32_0 = arith.constant 0 : i32
    %c0_i32_1 = arith.constant 0 : i32
    %c0_i32_2 = arith.constant 0 : i32
    return %c0_i32, %c0_i32_0, %c0_i32_1 : i32, i32, i32
  }
  func.func @transform_5(%arg0: i32) -> (i32, i32) {
    %c0_i32 = arith.constant 0 : i32
    %c0_i32_0 = arith.constant 0 : i32
    %c0_i32_1 = arith.constant 0 : i32
    return %c0_i32, %c0_i32_0 : i32, i32
  }
  func.func @transform_6(%arg0: i32) -> (i32, i32) {
    %c0_i32 = arith.constant 0 : i32
    %c0_i32_0 = arith.constant 0 : i32
    %c0_i32_1 = arith.constant 0 : i32
    return %c0_i32, %c0_i32_0 : i32, i32
  }
  func.func @transform_7(%arg0: i32) -> (i32, i32) {
    %c0_i32 = arith.constant 0 : i32
    %c0_i32_0 = arith.constant 0 : i32
    %c0_i32_1 = arith.constant 0 : i32
    return %c0_i32, %c0_i32_0 : i32, i32
  }
  func.func @transform_8(%arg0: i32) -> (i32, i32) {
    %c0_i32 = arith.constant 0 : i32
    %c0_i32_0 = arith.constant 0 : i32
    %c0_i32_1 = arith.constant 0 : i32
    return %c0_i32, %c0_i32_0 : i32, i32
  }
  func.func @transform_9(%arg0: i32) -> (i32, i32) {
    %c0_i32 = arith.constant 0 : i32
    %c0_i32_0 = arith.constant 0 : i32
    %c0_i32_1 = arith.constant 0 : i32
    return %c0_i32, %c0_i32_0 : i32, i32
  }
  func.func @transform_10(%arg0: i32) -> (i32, i32) {
    %c0_i32 = arith.constant 0 : i32
    %c0_i32_0 = arith.constant 0 : i32
    %c0_i32_1 = arith.constant 0 : i32
    return %c0_i32, %c0_i32_0 : i32, i32
  }
  func.func @transform_11(%arg0: i32) -> (i32, i32) {
    %c0_i32 = arith.constant 0 : i32
    %c0_i32_0 = arith.constant 0 : i32
    %c0_i32_1 = arith.constant 0 : i32
    return %c0_i32, %c0_i32_0 : i32, i32
  }
}

</mosaic_0001>

<bundles_post_ra>
// kernel: lstm_model_forward.4
= control target key start
LH: loop header
LB: loop body
LE: loop exit
PB: predicated region body
PF: predicated region fallthrough
CT: control target
= control target key end

     0   :  { %vm31_vm0 = vcmask 130048   ;;  %vm129_vm1 = vcmask 261120   ;;  %s706_s1 = inlined_call_operand.vmem [shape: f32[4,16,32], index: 1, kind: input, shape index: {}]   ;;  %s707_s0 = inlined_call_operand.vmem [shape: f32[32,16], index: 0, kind: input, shape index: {}]   ;;  %s708_s2 = inlined_call_operand.vmem [shape: f32[4,1,32], index: 2, kind: input, shape index: {}]   ;;  %s709_s3 = inlined_call_operand.vmem [shape: f32[32,32], index: 3, kind: output, shape index: {0}]   ;;  %s710_s4 = inlined_call_operand.vmem [shape: f32[32,32], index: 4, kind: output, shape index: {1}]   ;;  %s711_s5 = inlined_call_operand.vmem [shape: f32[32,32], index: 5, kind: output, shape index: {2}]   ;;  %s712_s6 = inlined_call_operand.vmem [shape: f32[32,32], index: 6, kind: output, shape index: {3}]  }
   0x1   :  { %v23_v0 = vld [vmem:[%s706_s1 + $0x8] sm:$0xff]  ;;  %v456_v1 = vld [vmem:[%s706_s1 + $0x18] sm:$0xff]  ;;  %v22_v2 = vld [vmem:[%s706_s1] sm:$0xff] }
   0x2   :  { %503 = vmatprep.subr.mxu0 %v23_v0  ;;  %513 = vmatprep.subr.mxu1 %v456_v1  ;;  %v455_v3 = vld [vmem:[%s706_s1 + $0x10] sm:$0xff]  ;;  %v18_v4 = vld [vmem:[%s707_s0] sm:$0xff]  ;;  %v19_v5 = vld [vmem:[%s707_s0 + $0x8] sm:$0xff] }
   0x3   :  { %504 = vmatpush3.msra.mxu0 %v23_v0  ;;  %514 = vmatpush3.msra.mxu1 %v456_v1  ;;  %v464_v6 = vld [vmem:[%s706_s1 + $0x28] sm:$0xff]  ;;  %v472_v7 = vld [vmem:[%s706_s1 + $0x38] sm:$0xff]  ;;  %v20_v8 = vld [vmem:[%s707_s0 + $0x10] sm:$0xff] }
   0x4   :  { %505 = vmatprep.subr.mxu0 %v22_v2  ;;  %515 = vmatprep.subr.mxu1 %v455_v3  ;;  %v21_v9 = vld [vmem:[%s707_s0 + $0x18] sm:$0xff]  ;;  %v463_v10 = vld [vmem:[%s706_s1 + $0x20] sm:$0xff]  ;;  %v471_v11 = vld [vmem:[%s706_s1 + $0x30] sm:$0xff] }
   0x5   :  { %506 = vmatpush3.msra.mxu0 %v22_v2  ;;  %507 = vmatprep.mubr.msk.f32.mxu0 %vm31_vm0, %v18_v4  ;;  %v450_v12 = vld [vmem:[%s708_s2] ss:$0 sm:$0xff]  ;;  %v458_v13 = vld [vmem:[%s708_s2 + $0x1] ss:$0 sm:$0xff]  ;;  %v466_v28 = vld [vmem:[%s708_s2 + $0x2] ss:$0 sm:$0xff] }
   0x6   :  { %516 = vmatpush3.msra.mxu1 %v455_v3  ;;  %517 = vmatprep.mubr.msk.f32.mxu1 %vm31_vm0, %v18_v4  ;;  %v474_v29 = vld [vmem:[%s708_s2 + $0x3] ss:$0 sm:$0xff] }
   0x7   :  { %508 = vmatmul.mubr.msk.f32.vlgmr.msra.gmra.mxu0 %vm31_vm0, %v19_v5  ;;  %518 = vmatmul.mubr.msk.f32.vlgmr.msra.gmra.mxu1 %vm31_vm0, %v19_v5 }
   0x8   :  { %523 = vmatprep.subr.mxu0 %v464_v6  ;;  %533 = vmatprep.subr.mxu1 %v472_v7 }
   0x9   :  { %524 = vmatpush3.msra.mxu0 %v464_v6  ;;  %534 = vmatpush3.msra.mxu1 %v472_v7 }
   0xa   :  { %510 = vmatprep.mubr.msk.f32.mxu0 %vm31_vm0, %v20_v8  ;;  %520 = vmatprep.mubr.msk.f32.mxu1 %vm31_vm0, %v20_v8 }
   0xb   :  { %511 = vmatmul.mubr.msk.f32.gmra.mxu0 %vm31_vm0, %v21_v9  ;;  %521 = vmatmul.mubr.msk.f32.gmra.mxu1 %vm31_vm0, %v21_v9 }
   0xc   :  { %525 = vmatprep.subr.mxu0 %v463_v10  ;;  %535 = vmatprep.subr.mxu1 %v471_v11 }
   0xd   :  { %526 = vmatpush3.msra.mxu0 %v463_v10  ;;  %536 = vmatpush3.msra.mxu1 %v471_v11 }
   0xe   :  { %527 = vmatprep.mubr.msk.f32.mxu0 %vm31_vm0, %v18_v4  ;;  %537 = vmatprep.mubr.msk.f32.mxu1 %vm31_vm0, %v18_v4 }
   0xf   :  { %528 = vmatmul.mubr.msk.f32.vlgmr.msra.gmra.mxu0 %vm31_vm0, %v19_v5  ;;  %538 = vmatmul.mubr.msk.f32.vlgmr.msra.gmra.mxu1 %vm31_vm0, %v19_v5 }
  0x10   :  { %530 = vmatprep.mubr.msk.f32.mxu0 %vm31_vm0, %v20_v8  ;;  %540 = vmatprep.mubr.msk.f32.mxu1 %vm31_vm0, %v20_v8 }
  0x13   :  { %531 = vmatmul.mubr.msk.f32.gmra.mxu0 %vm31_vm0, %v21_v9  ;;  %541 = vmatmul.mubr.msk.f32.gmra.mxu1 %vm31_vm0, %v21_v9 }
  0xc7   :  { %v509_v14 = vpop.f32.mrf.mxu0  ;;  %v519_v15 = vpop.f32.mrf.mxu1 }
  0xc8   :  { %v116_v16 = vadd.f32 %v509_v14, %v450_v12  ;;  %v217_v17 = vadd.f32 %v519_v15, %v458_v13 }
  0xc9   :  { %v110_v18 = vpop.f32.mrf.mxu0  ;;  %v211_v19 = vpop.f32.mrf.mxu1 }
  0xca   :  { %131 = vst.msk [vmem:[%s709_s3 + $0x8] sm:$0xff] %vm129_vm1, %v116_v16  ;;  %231 = vst.msk [vmem:[%s710_s4 + $0x8] sm:$0xff] %vm129_vm1, %v217_v17  ;;  %v111_v20 = vadd.f32 %v450_v12, %v110_v18  ;;  %v212_v21 = vadd.f32 %v458_v13, %v211_v19 }
  0xcb   :  { %v512_v22 = vpop.f32.mrf.mxu0  ;;  %v522_v23 = vpop.f32.mrf.mxu1 }
  0xcc   :  { %130 = vst.msk [vmem:[%s709_s3] sm:$0xff] %vm129_vm1, %v111_v20  ;;  %230 = vst.msk [vmem:[%s710_s4] sm:$0xff] %vm129_vm1, %v212_v21  ;;  %v126_v24 = vadd.f32 %v512_v22, %v450_v12  ;;  %v227_v25 = vadd.f32 %v522_v23, %v458_v13 }
  0xcd   :  { %v120_v26 = vpop.f32.mrf.mxu0  ;;  %v221_v27 = vpop.f32.mrf.mxu1 }
  0xce   :  { %133 = vst.msk [vmem:[%s709_s3 + $0x18] sm:$0xff] %vm129_vm1, %v126_v24  ;;  %233 = vst.msk [vmem:[%s710_s4 + $0x18] sm:$0xff] %vm129_vm1, %v227_v25  ;;  %v121_v30 = vadd.f32 %v450_v12, %v120_v26  ;;  %v222_v31 = vadd.f32 %v458_v13, %v221_v27 }
  0xcf   :  { %v529_v32 = vpop.f32.mrf.mxu0  ;;  %v539_v33 = vpop.f32.mrf.mxu1 }
  0xd0   :  { %132 = vst.msk [vmem:[%s709_s3 + $0x10] sm:$0xff] %vm129_vm1, %v121_v30  ;;  %232 = vst.msk [vmem:[%s710_s4 + $0x10] sm:$0xff] %vm129_vm1, %v222_v31  ;;  %v317_v34 = vadd.f32 %v529_v32, %v466_v28  ;;  %v417_v35 = vadd.f32 %v539_v33, %v474_v29 }
  0xd1   :  { %v311_v36 = vpop.f32.mrf.mxu0  ;;  %v411_v37 = vpop.f32.mrf.mxu1 }
  0xd2   :  { %331 = vst.msk [vmem:[%s711_s5 + $0x8] sm:$0xff] %vm129_vm1, %v317_v34  ;;  %431 = vst.msk [vmem:[%s712_s6 + $0x8] sm:$0xff] %vm129_vm1, %v417_v35  ;;  %v312_v38 = vadd.f32 %v466_v28, %v311_v36  ;;  %v412_v39 = vadd.f32 %v474_v29, %v411_v37 }
  0xd3   :  { %v532_v40 = vpop.f32.mrf.mxu0  ;;  %v542_v41 = vpop.f32.mrf.mxu1 }
  0xd4   :  { %330 = vst.msk [vmem:[%s711_s5] sm:$0xff] %vm129_vm1, %v312_v38  ;;  %430 = vst.msk [vmem:[%s712_s6] sm:$0xff] %vm129_vm1, %v412_v39  ;;  %v327_v42 = vadd.f32 %v532_v40, %v466_v28  ;;  %v427_v43 = vadd.f32 %v542_v41, %v474_v29 }
  0xd5   :  { %v321_v44 = vpop.f32.mrf.mxu0  ;;  %v421_v45 = vpop.f32.mrf.mxu1 }
  0xd6   :  { %333 = vst.msk [vmem:[%s711_s5 + $0x18] sm:$0xff] %vm129_vm1, %v327_v42  ;;  %433 = vst.msk [vmem:[%s712_s6 + $0x18] sm:$0xff] %vm129_vm1, %v427_v43  ;;  %v322_v46 = vadd.f32 %v466_v28, %v321_v44  ;;  %v422_v47 = vadd.f32 %v474_v29, %v421_v45 }
  0xd8   :  { %332 = vst.msk [vmem:[%s711_s5 + $0x10] sm:$0xff] %vm129_vm1, %v322_v46  ;;  %432 = vst.msk [vmem:[%s712_s6 + $0x10] sm:$0xff] %vm129_vm1, %v422_v47 }

// kernel: lstm_model_forward.6
= control target key start
LH: loop header
LB: loop body
LE: loop exit
PB: predicated region body
PF: predicated region fallthrough
CT: control target
= control target key end

     0   :  { %vm33_vm0 = vcmask 261120   ;;  %s767_s1 = inlined_call_operand.vmem [shape: f32[4,32,32], index: 1, kind: input, shape index: {}]   ;;  %s768_s0 = inlined_call_operand.vmem [shape: f32[32,32], index: 0, kind: input, shape index: {}]   ;;  %s769_s2 = inlined_call_operand.vmem [shape: f32[4,1,32], index: 2, kind: input, shape index: {}]   ;;  %s770_s3 = inlined_call_operand.vmem [shape: f32[32,32], index: 3, kind: output, shape index: {0}]   ;;  %s771_s4 = inlined_call_operand.vmem [shape: f32[32,32], index: 4, kind: output, shape index: {1}]   ;;  %s772_s5 = inlined_call_operand.vmem [shape: f32[32,32], index: 5, kind: output, shape index: {2}]   ;;  %s773_s6 = inlined_call_operand.vmem [shape: f32[32,32], index: 6, kind: output, shape index: {3}]  }
   0x1   :  { %v25_v0 = vld [vmem:[%s767_s1 + $0x18] sm:$0xff]  ;;  %v24_v2 = vld [vmem:[%s767_s1 + $0x10] sm:$0xff]  ;;  %v23_v4 = vld [vmem:[%s767_s1 + $0x8] sm:$0xff] }
   0x2   :  { %v465_v1 = vld [vmem:[%s767_s1 + $0x38] sm:$0xff]  ;;  %524 = vmatprep.subr.mxu0 %v25_v0  ;;  %v464_v3 = vld [vmem:[%s767_s1 + $0x30] sm:$0xff]  ;;  %v463_v5 = vld [vmem:[%s767_s1 + $0x28] sm:$0xff] }
   0x3   :  { %538 = vmatprep.subr.mxu1 %v465_v1  ;;  %525 = vmatpush3.msra.mxu0 %v25_v0  ;;  %v22_v6 = vld [vmem:[%s767_s1] sm:$0xff]  ;;  %v19_v9 = vld [vmem:[%s768_s0 + $0x8] sm:$0xff]  ;;  %v475_v10 = vld [vmem:[%s767_s1 + $0x58] sm:$0xff] }
   0x4   :  { %539 = vmatpush3.msra.mxu1 %v465_v1  ;;  %526 = vmatprep.subr.mxu0 %v24_v2  ;;  %v462_v7 = vld [vmem:[%s767_s1 + $0x20] sm:$0xff]  ;;  %v485_v11 = vld [vmem:[%s767_s1 + $0x78] sm:$0xff]  ;;  %v474_v12 = vld [vmem:[%s767_s1 + $0x50] sm:$0xff] }
   0x5   :  { %540 = vmatprep.subr.mxu1 %v464_v3  ;;  %527 = vmatpush3.msra.mxu0 %v24_v2  ;;  %v18_v8 = vld [vmem:[%s768_s0] sm:$0xff]  ;;  %v484_v13 = vld [vmem:[%s767_s1 + $0x70] sm:$0xff]  ;;  %v21_v15 = vld [vmem:[%s768_s0 + $0x18] sm:$0xff] }
   0x6   :  { %541 = vmatpush3.msra.mxu1 %v464_v3  ;;  %528 = vmatprep.subr.mxu0 %v23_v4  ;;  %v20_v14 = vld [vmem:[%s768_s0 + $0x10] sm:$0xff]  ;;  %v473_v16 = vld [vmem:[%s767_s1 + $0x48] sm:$0xff]  ;;  %v472_v18 = vld [vmem:[%s767_s1 + $0x40] sm:$0xff] }
   0x7   :  { %542 = vmatprep.subr.mxu1 %v463_v5  ;;  %529 = vmatpush3.msra.mxu0 %v23_v4  ;;  %v483_v17 = vld [vmem:[%s767_s1 + $0x68] sm:$0xff]  ;;  %v482_v19 = vld [vmem:[%s767_s1 + $0x60] sm:$0xff] }
   0x8   :  { %543 = vmatpush3.msra.mxu1 %v463_v5  ;;  %530 = vmatprep.subr.mxu0 %v22_v6  ;;  %v457_v20 = vld [vmem:[%s769_s2] ss:$0 sm:$0xff]  ;;  %v467_v21 = vld [vmem:[%s769_s2 + $0x1] ss:$0 sm:$0xff]  ;;  %v477_v38 = vld [vmem:[%s769_s2 + $0x2] ss:$0 sm:$0xff] }
   0x9   :  { %544 = vmatprep.subr.mxu1 %v462_v7  ;;  %531 = vmatpush3.msra.mxu0 %v22_v6  ;;  %v487_v39 = vld [vmem:[%s769_s2 + $0x3] ss:$0 sm:$0xff] }
   0xa   :  { %532 = vmatprep.mubr.msk.f32.mxu0 %vm33_vm0, %v18_v8  ;;  %545 = vmatpush3.msra.mxu1 %v462_v7 }
   0xb   :  { %546 = vmatprep.mubr.msk.f32.mxu1 %vm33_vm0, %v18_v8  ;;  %533 = vmatmul.mubr.msk.f32.vlgmr.msra.gmra.mxu0 %vm33_vm0, %v19_v9 }
   0xc   :  { %547 = vmatmul.mubr.msk.f32.vlgmr.msra.gmra.mxu1 %vm33_vm0, %v19_v9  ;;  %552 = vmatprep.subr.mxu0 %v475_v10 }
   0xd   :  { %566 = vmatprep.subr.mxu1 %v485_v11  ;;  %553 = vmatpush3.msra.mxu0 %v475_v10 }
   0xe   :  { %567 = vmatpush3.msra.mxu1 %v485_v11  ;;  %554 = vmatprep.subr.mxu0 %v474_v12 }
   0xf   :  { %568 = vmatprep.subr.mxu1 %v484_v13  ;;  %535 = vmatprep.mubr.msk.f32.mxu0 %vm33_vm0, %v20_v14 }
  0x10   :  { %549 = vmatprep.mubr.msk.f32.mxu1 %vm33_vm0, %v20_v14  ;;  %555 = vmatpush3.msra.mxu0 %v474_v12 }
  0x11   :  { %569 = vmatpush3.msra.mxu1 %v484_v13  ;;  %536 = vmatmul.mubr.msk.f32.gmra.mxu0 %vm33_vm0, %v21_v15 }
  0x12   :  { %550 = vmatmul.mubr.msk.f32.gmra.mxu1 %vm33_vm0, %v21_v15  ;;  %556 = vmatprep.subr.mxu0 %v473_v16 }
  0x13   :  { %570 = vmatprep.subr.mxu1 %v483_v17  ;;  %557 = vmatpush3.msra.mxu0 %v473_v16 }
  0x14   :  { %571 = vmatpush3.msra.mxu1 %v483_v17  ;;  %558 = vmatprep.subr.mxu0 %v472_v18 }
  0x15   :  { %572 = vmatprep.subr.mxu1 %v482_v19  ;;  %559 = vmatpush3.msra.mxu0 %v472_v18 }
  0x16   :  { %560 = vmatprep.mubr.msk.f32.mxu0 %vm33_vm0, %v18_v8  ;;  %573 = vmatpush3.msra.mxu1 %v482_v19 }
  0x17   :  { %574 = vmatprep.mubr.msk.f32.mxu1 %vm33_vm0, %v18_v8  ;;  %561 = vmatmul.mubr.msk.f32.vlgmr.msra.gmra.mxu0 %vm33_vm0, %v19_v9 }
  0x18   :  { %575 = vmatmul.mubr.msk.f32.vlgmr.msra.gmra.mxu1 %vm33_vm0, %v19_v9  ;;  %563 = vmatprep.mubr.msk.f32.mxu0 %vm33_vm0, %v20_v14 }
  0x19   :  { %577 = vmatprep.mubr.msk.f32.mxu1 %vm33_vm0, %v20_v14 }
  0x1b   :  { %564 = vmatmul.mubr.msk.f32.gmra.mxu0 %vm33_vm0, %v21_v15 }
  0x1c   :  { %578 = vmatmul.mubr.msk.f32.gmra.mxu1 %vm33_vm0, %v21_v15 }
  0xcb   :  { %v534_v22 = vpop.f32.mrf.mxu0 }
  0xcc   :  { %v548_v23 = vpop.f32.mrf.mxu1  ;;  %v118_v24 = vadd.f32 %v534_v22, %v457_v20 }
  0xcd   :  { %v220_v25 = vadd.f32 %v548_v23, %v467_v21  ;;  %v112_v26 = vpop.f32.mrf.mxu0 }
  0xce   :  { %v214_v27 = vpop.f32.mrf.mxu1  ;;  %132 = vst.msk [vmem:[%s770_s3 + $0x8] sm:$0xff] %vm33_vm0, %v118_v24  ;;  %v113_v28 = vadd.f32 %v457_v20, %v112_v26 }
  0xcf   :  { %234 = vst.msk [vmem:[%s771_s4 + $0x8] sm:$0xff] %vm33_vm0, %v220_v25  ;;  %v215_v29 = vadd.f32 %v467_v21, %v214_v27 }
  0xd0   :  { %131 = vst.msk [vmem:[%s770_s3] sm:$0xff] %vm33_vm0, %v113_v28 }
  0xd1   :  { %233 = vst.msk [vmem:[%s771_s4] sm:$0xff] %vm33_vm0, %v215_v29  ;;  %v537_v30 = vpop.f32.mrf.mxu0 }
  0xd2   :  { %v551_v31 = vpop.f32.mrf.mxu1  ;;  %v128_v32 = vadd.f32 %v537_v30, %v457_v20 }
  0xd3   :  { %v230_v33 = vadd.f32 %v551_v31, %v467_v21  ;;  %v122_v34 = vpop.f32.mrf.mxu0 }
  0xd4   :  { %v224_v35 = vpop.f32.mrf.mxu1  ;;  %134 = vst.msk [vmem:[%s770_s3 + $0x18] sm:$0xff] %vm33_vm0, %v128_v32  ;;  %v123_v36 = vadd.f32 %v457_v20, %v122_v34 }
  0xd5   :  { %236 = vst.msk [vmem:[%s771_s4 + $0x18] sm:$0xff] %vm33_vm0, %v230_v33  ;;  %v225_v37 = vadd.f32 %v467_v21, %v224_v35 }
  0xd6   :  { %133 = vst.msk [vmem:[%s770_s3 + $0x10] sm:$0xff] %vm33_vm0, %v123_v36 }
  0xd7   :  { %235 = vst.msk [vmem:[%s771_s4 + $0x10] sm:$0xff] %vm33_vm0, %v225_v37  ;;  %v562_v40 = vpop.f32.mrf.mxu0 }
  0xd8   :  { %v576_v41 = vpop.f32.mrf.mxu1  ;;  %v322_v42 = vadd.f32 %v562_v40, %v477_v38 }
  0xd9   :  { %v424_v43 = vadd.f32 %v576_v41, %v487_v39  ;;  %v316_v44 = vpop.f32.mrf.mxu0 }
  0xda   :  { %v418_v45 = vpop.f32.mrf.mxu1  ;;  %336 = vst.msk [vmem:[%s772_s5 + $0x8] sm:$0xff] %vm33_vm0, %v322_v42  ;;  %v317_v46 = vadd.f32 %v477_v38, %v316_v44 }
  0xdb   :  { %438 = vst.msk [vmem:[%s773_s6 + $0x8] sm:$0xff] %vm33_vm0, %v424_v43  ;;  %v419_v47 = vadd.f32 %v487_v39, %v418_v45  ;;  %v565_v48 = vpop.f32.mrf.mxu0 }
  0xdc   :  { %v579_v49 = vpop.f32.mrf.mxu1  ;;  %335 = vst.msk [vmem:[%s772_s5] sm:$0xff] %vm33_vm0, %v317_v46  ;;  %v332_v50 = vadd.f32 %v565_v48, %v477_v38 }
  0xdd   :  { %437 = vst.msk [vmem:[%s773_s6] sm:$0xff] %vm33_vm0, %v419_v47  ;;  %v434_v51 = vadd.f32 %v579_v49, %v487_v39  ;;  %v326_v52 = vpop.f32.mrf.mxu0 }
  0xde   :  { %v428_v53 = vpop.f32.mrf.mxu1  ;;  %338 = vst.msk [vmem:[%s772_s5 + $0x18] sm:$0xff] %vm33_vm0, %v332_v50  ;;  %v327_v54 = vadd.f32 %v477_v38, %v326_v52 }
  0xdf   :  { %440 = vst.msk [vmem:[%s773_s6 + $0x18] sm:$0xff] %vm33_vm0, %v434_v51  ;;  %v429_v55 = vadd.f32 %v487_v39, %v428_v53 }
  0xe0   :  { %337 = vst.msk [vmem:[%s772_s5 + $0x10] sm:$0xff] %vm33_vm0, %v327_v54 }
  0xe1   :  { %439 = vst.msk [vmem:[%s773_s6 + $0x10] sm:$0xff] %vm33_vm0, %v429_v55 }

// kernel: lstm_model_forward.5
= control target key start
LH: loop header
LB: loop body
LE: loop exit
PB: predicated region body
PF: predicated region fallthrough
CT: control target
= control target key end

     0   :  { %s947_s18 = smov 0   ;;  %s1077_s0 = inlined_call_operand.vmem [shape: f32[8,4,32], index: 0, kind: input, shape index: {}]   ;;  %s1078_s1 = inlined_call_operand.vmem [shape: f32[8,4,32], index: 1, kind: input, shape index: {}]   ;;  %s1079_s2 = inlined_call_operand.vmem [shape: f32[8,4,32], index: 2, kind: input, shape index: {}]   ;;  %s1080_s3 = inlined_call_operand.vmem [shape: f32[8,4,32], index: 3, kind: input, shape index: {}]   ;;  %s1081_s4 = inlined_call_operand.vmem [shape: f32[4,32,32], index: 4, kind: input, shape index: {}]   ;;  %s1082_s5 = inlined_call_operand.vmem [shape: f32[8,4,32], index: 5, kind: output, shape index: {}]  }
   0x1 LB: > { %s761_s19 = sadd.s32 4294967295, %s908_s18   ;;  %p765_p0 = scmp.ge.s32.totalorder %s908_s18, 1  ;;  %s908_s18 = sphi %s947_s18, %s15_s18  }
   0x2   : > { %p221_p1 = scmp.lt.s32.totalorder %s908_s18, 3 }
   0x4   : > { %p222_p2 = pnand %p765_p0, %p221_p1 }
   0x5   : > { %s766_s20 = sshll.u32 (!%p222_p2), %s761_s19, 2  ;;  %p776_p4 = scmp.ne.s32.totalorder (!%p222_p2), %s761_s19, 0 }
   0x6   : > { %225 = sbr.rel (%p222_p2) target bundleno = 278 (0x116), region = 40  ;;  %p265_p3 = scmp.lt.s32.totalorder (!%p222_p2), %s766_s20, 7 }
   0xb   : > { %s1084_s20 = smov (!%p265_p3, %s766_s20), 7  ;;  %297 = sbr.rel (%p776_p4) target bundleno = 18 (0x12), region = 44 }
   0xc   : > { %s955_s21 = sshll.u32 %s1084_s20, 2 }
   0xd   : > { %s268_s24 = scalar_lea.vmem %s1077_s0, %s955_s21  ;;  %s274_s27 = scalar_lea.vmem %s1078_s1, %s955_s21 }
   0xe   : > { %s280_s30 = scalar_lea.vmem %s1079_s2, %s955_s21  ;;  %s286_s8 = scalar_lea.vmem %s1080_s3, %s955_s21 }
   0xf   : > { %s292_s11 = scalar_lea.vmem %s1082_s5, %s955_s21 }
  0x10   : > { %vm298_vm0 = vcmask 257024   ;;  %v914_v0 = vmov 0.0  }
  0x11   : > { %299 = vst.msk [vmem:[#allocation2] sm:$0xf] %vm298_vm0, %v914_v0  ;;  %300 = vst.msk [vmem:[#allocation3] sm:$0xf] %vm298_vm0, %v914_v0 }
  0x12 PF: > { %s977_s12 = smov 0  }
  0x13 LB: >> { %v315_v1 = vld [vmem:[%s1081_s4 + $0x18] sm:$0xff]  ;;  %v915_v3 = vmov 0.0   ;;  %v314_v4 = vld [vmem:[%s1081_s4 + $0x10] sm:$0xff]  ;;  %v313_v6 = vld [vmem:[%s1081_s4 + $0x8] sm:$0xff]  ;;  %vm316_vm1 = vcmask 261120   ;;  %vm916_vm2 = vmmov 0   ;;  %s912_s12 = sphi %s977_s12, %s306_s12  }
  0x14   : >> { %v783_v2 = vld [vmem:[%s1081_s4 + $0x38] sm:$0xff]  ;;  %819 = vmatprep.subr.mxu0 %v915_v3  ;;  %830 = vmatprep.subr.mxu1 %v915_v3  ;;  %v782_v5 = vld [vmem:[%s1081_s4 + $0x30] sm:$0xff]  ;;  %v781_v7 = vld [vmem:[%s1081_s4 + $0x28] sm:$0xff]  ;;  %s1039_s9 = sshll.u32 %s912_s12, 2  ;;  %vm649_vm3 = vcmask 257024   ;;  %s306_s12 = sadd.s32 1, %s912_s12  }
  0x15   : >> { %820 = vmatpush3.msra.mxu0 %v315_v1  ;;  %831 = vmatpush3.msra.mxu1 %v783_v2  ;;  %v312_v8 = vld [vmem:[%s1081_s4] sm:$0xff]  ;;  %v789_v11 = vld [vmem:[%s1081_s4 + $0x58] sm:$0xff]  ;;  %v788_v13 = vld [vmem:[%s1081_s4 + $0x50] sm:$0xff]  ;;  %s310_s14 = scalar_lea.vmem %s268_s24, %s1039_s9  ;;  %s397_s17 = scalar_lea.vmem %s274_s27, %s1039_s9 }
  0x16   : >> { %821 = vmatprep.subr.mxu0 %v915_v3  ;;  %832 = vmatprep.subr.mxu1 %v915_v3  ;;  %v780_v9 = vld [vmem:[%s1081_s4 + $0x20] sm:$0xff]  ;;  %v794_v12 = vld [vmem:[%s1081_s4 + $0x78] sm:$0xff]  ;;  %v793_v14 = vld [vmem:[%s1081_s4 + $0x70] sm:$0xff]  ;;  %s560_s22 = scalar_lea.vmem %s286_s8, %s1039_s9  ;;  %s481_s26 = scalar_lea.vmem %s280_s30, %s1039_s9 }
  0x17   : >> { %822 = vmatpush3.msra.mxu0 %v314_v4  ;;  %833 = vmatpush3.msra.mxu1 %v782_v5  ;;  %v787_v15 = vld [vmem:[%s1081_s4 + $0x48] sm:$0xff]  ;;  %v786_v17 = vld [vmem:[%s1081_s4 + $0x40] sm:$0xff]  ;;  %s652_s6 = scalar_lea.vmem %s292_s11, %s1039_s9  ;;  %p303_p5 = scmp.ge.s32.totalorder %s306_s12, 4  }
  0x18   : >> { %823 = vmatprep.subr.mxu0 %v915_v3  ;;  %834 = vmatprep.subr.mxu1 %v915_v3  ;;  %v307_v10 = vld [vmem:[#allocation2] sm:$0xf]  ;;  %v792_v16 = vld [vmem:[%s1081_s4 + $0x68] sm:$0xff]  ;;  %v308_v44 = vld [vmem:[#allocation3] sm:$0xf] }
  0x19   : >> { %824 = vmatpush3.msra.mxu0 %v313_v6  ;;  %835 = vmatpush3.msra.mxu1 %v781_v7  ;;  %v791_v18 = vld [vmem:[%s1081_s4 + $0x60] sm:$0xff] }
  0x1a   : >> { %825 = vmatprep.subr.mxu0 %v915_v3  ;;  %836 = vmatprep.subr.mxu1 %v915_v3  ;;  %v311_v19 = vld [vmem:[%s310_s14] sm:$0xf] }
  0x1b   : >> { %826 = vmatpush3.msra.mxu0 %v312_v8  ;;  %827 = vmatprep.mubr.msk.f32.mxu0 %vm916_vm2, %v915_v3  ;;  %v398_v20 = vld [vmem:[%s397_s17] sm:$0xf] }
  0x1c   : >> { %837 = vmatpush3.msra.mxu1 %v780_v9  ;;  %838 = vmatprep.mubr.msk.f32.mxu1 %vm916_vm2, %v915_v3  ;;  %v561_v29 = vld [vmem:[%s560_s22] sm:$0xf] }
  0x1d   : >> { %828 = vmatmul.mubr.msk.f32.vlgmr.msra.gmra.mxu0 %vm316_vm1, %v307_v10  ;;  %839 = vmatmul.mubr.msk.f32.vlgmr.msra.gmra.mxu1 %vm316_vm1, %v307_v10  ;;  %v482_v33 = vld [vmem:[%s481_s26] sm:$0xf] }
  0x1e   : >> { %841 = vmatprep.subr.mxu0 %v915_v3  ;;  %852 = vmatprep.subr.mxu1 %v915_v3 }
  0x1f   : >> { %842 = vmatpush3.msra.mxu0 %v789_v11  ;;  %853 = vmatpush3.msra.mxu1 %v794_v12 }
  0x20   : >> { %843 = vmatprep.subr.mxu0 %v915_v3  ;;  %854 = vmatprep.subr.mxu1 %v915_v3 }
  0x21   : >> { %844 = vmatpush3.msra.mxu0 %v788_v13  ;;  %855 = vmatpush3.msra.mxu1 %v793_v14 }
  0x22   : >> { %845 = vmatprep.subr.mxu0 %v915_v3  ;;  %856 = vmatprep.subr.mxu1 %v915_v3 }
  0x23   : >> { %846 = vmatpush3.msra.mxu0 %v787_v15  ;;  %857 = vmatpush3.msra.mxu1 %v792_v16 }
  0x24   : >> { %847 = vmatprep.subr.mxu0 %v915_v3  ;;  %858 = vmatprep.subr.mxu1 %v915_v3 }
  0x25   : >> { %848 = vmatpush3.msra.mxu0 %v786_v17  ;;  %849 = vmatprep.mubr.msk.f32.mxu0 %vm916_vm2, %v915_v3 }
  0x26   : >> { %859 = vmatpush3.msra.mxu1 %v791_v18  ;;  %860 = vmatprep.mubr.msk.f32.mxu1 %vm916_vm2, %v915_v3 }
  0x27   : >> { %850 = vmatmul.mubr.msk.f32.vlgmr.msra.gmra.mxu0 %vm316_vm1, %v307_v10  ;;  %861 = vmatmul.mubr.msk.f32.vlgmr.msra.gmra.mxu1 %vm316_vm1, %v307_v10 }
  0xdd   : >> { %v386_v21 = vpop.f32.mrf.mxu0  ;;  %v470_v22 = vpop.f32.mrf.mxu1 }
  0xde   : >> { %v390_v23 = vadd.f32 %v386_v21, %v311_v19  ;;  %v474_v24 = vadd.f32 %v470_v22, %v398_v20 }
  0xdf   : >> { %v829_v25 = vpop.f32.mrf.mxu0  ;;  %v840_v26 = vpop.f32.mrf.mxu1 }
  0xe0   : >> { %v779_v27 = vmul.f32 -1.442695, %v390_v23  ;;  %v785_v28 = vmul.f32 -1.442695, %v474_v24 }
  0xe2   : >> { %882 = vpow2.f32 %v779_v27 }
  0xe3   : >> { %884 = vpow2.f32 %v785_v28 }
  0xe7   : >> { %v554_v30 = vpop.f32.mrf.mxu0  ;;  %v633_v31 = vpop.f32.mrf.mxu1 }
  0xe8   : >> { %v637_v32 = vadd.f32 %v633_v31, %v561_v29  ;;  %v558_v37 = vadd.f32 %v554_v30, %v482_v33 }
  0xe9   : >> { %v851_v34 = vpop.f32.mrf.mxu0  ;;  %v862_v35 = vpop.f32.mrf.mxu1 }
  0xea   : >> { %v796_v36 = vmul.f32 -1.442695, %v637_v32 }
  0xec   : >> { %886 = vpow2.f32 %v796_v36 }
  0xed   : >> { %888 = vtanh.f32 %v558_v37 }
  0xef   : >> { %v883_v38 = vpop.eup %882 }
  0xf0   : >> { %v885_v39 = vpop.eup %884  ;;  %v394_v40 = vadd.f32 1.0, %v883_v38 }
  0xf1   : >> { %v478_v41 = vadd.f32 1.0, %v885_v39 }
  0xf2   : >> { %890 = vrcp.f32 %v394_v40 }
  0xf3   : >> { %892 = vrcp.f32 %v478_v41 }
  0xf9   : >> { %v887_v42 = vpop.eup %886 }
  0xfa   : >> { %v889_v43 = vpop.eup %888  ;;  %v641_v46 = vadd.f32 1.0, %v887_v42 }
  0xfc   : >> { %894 = vrcp.f32 %v641_v46 }
  0xff   : >> { %v891_v45 = vpop.eup %890 }
 0x100   : >> { %v893_v47 = vpop.eup %892  ;;  %v645_v48 = vmul.f32 %v891_v45, %v889_v43 }
 0x101   : >> { %v644_v49 = vmul.f32 %v893_v47, %v308_v44 }
 0x103   : >> { %v646_v50 = vadd.f32 %v645_v48, %v644_v49 }
 0x105   : >> { %896 = vtanh.f32 %v646_v50  ;;  %650 = vst.msk [vmem:[#allocation3] sm:$0xf] %vm649_vm3, %v646_v50 }
 0x109   : >> { %v895_v51 = vpop.eup %894 }
 0x111   : > { %305 = sbr.rel (!%p303_p5) target bundleno = 19 (0x13), region = 98 }
 0x112   : >> { %v897_v52 = vpop.eup %896 }
 0x113   : >> { %v648_v53 = vmul.f32 %v897_v52, %v895_v51 }
 0x115   : >> { %651 = vst.msk [vmem:[#allocation2] sm:$0xf] %vm649_vm3, %v648_v53  ;;  %653 = vst.msk [vmem:[%s652_s6] sm:$0xf] %vm649_vm3, %v648_v53 }
 0x116 PF: > { %s15_s18 = sadd.s32 1, %s908_s18  }
 0x117   : > { %p12_p6 = scmp.ge.s32.totalorder %s15_s18, 4  }
 0x119   :  { %14 = sbr.rel (!%p12_p6) target bundleno = 1 (0x1), region = 109 }

// kernel: lstm_model_forward.7
= control target key start
LH: loop header
LB: loop body
LE: loop exit
PB: predicated region body
PF: predicated region fallthrough
CT: control target
= control target key end

     0   :  { %16 = vsyncpa [#allocation5], 0  ;;  %s1300_s17 = smov 0   ;;  %s1459_s0 = inlined_call_operand.vmem [shape: f32[8,4,32], index: 0, kind: input, shape index: {}]   ;;  %s1460_s1 = inlined_call_operand.vmem [shape: f32[8,4,32], index: 1, kind: input, shape index: {}]   ;;  %s1461_s2 = inlined_call_operand.vmem [shape: f32[8,4,32], index: 2, kind: input, shape index: {}]   ;;  %s1462_s3 = inlined_call_operand.vmem [shape: f32[8,4,32], index: 3, kind: input, shape index: {}]   ;;  %s1463_s4 = inlined_call_operand.vmem [shape: f32[4,32,32], index: 4, kind: input, shape index: {}]   ;;  %s1464_s5 = inlined_call_operand.vmem [shape: f32[1,32], index: 5, kind: input, shape index: {}]   ;;  %s1465_s6 = inlined_call_operand.vmem [shape: f32[1,32], index: 6, kind: input, shape index: {}]   ;;  %s1466_s7 = inlined_call_operand.vmem [shape: f32[1,32], index: 7, kind: input, shape index: {}]   ;;  %s1467_s8 = inlined_call_operand.vmem [shape: f32[1,32], index: 8, kind: input, shape index: {}]   ;;  %s1468_s9 = inlined_call_operand.vmem [shape: f32[32,8], index: 9, kind: input, shape index: {}]   ;;  %s1469_s10 = inlined_call_operand.vmem [shape: f32[1,8], index: 10, kind: input, shape index: {}]   ;;  %s1470_s11 = inlined_call_operand.hbm [shape: f32[4,8], index: 11, kind: output, shape index: {}]  }
   0x1 LB: > { %s1306_s18 = sadd.s32 4294967295, %s1228_s17   ;;  %p1024_p0 = scmp.ge.s32.totalorder %s1228_s17, 1  ;;  %s1228_s17 = sphi %s1300_s17, %s22_s17  }
   0x2   : > { %p367_p1 = scmp.lt.s32.totalorder %s1228_s17, 3 }
   0x4   : > { %p368_p2 = pnand %p1024_p0, %p367_p1 }
   0x5   : > { %s1025_s19 = sshll.u32 (!%p368_p2), %s1306_s18, 2  ;;  %p1033_p4 = scmp.ne.s32.totalorder (!%p368_p2), %s1306_s18, 0 }
   0x6   : > { %371 = sbr.rel (%p368_p2) target bundleno = 521 (0x209), region = 64  ;;  %p418_p3 = scmp.lt.s32.totalorder (!%p368_p2), %s1025_s19, 7 }
   0xb   : > { %s1472_s19 = smov (!%p418_p3, %s1025_s19), 7  ;;  %444 = sbr.rel (%p1033_p4) target bundleno = 18 (0x12), region = 68 }
   0xc   : > { %s1311_s20 = sshll.u32 %s1472_s19, 2 }
   0xd   : > { %s421_s23 = scalar_lea.vmem %s1459_s0, %s1311_s20  ;;  %s427_s26 = scalar_lea.vmem %s1460_s1, %s1311_s20 }
   0xe   : > { %s433_s29 = scalar_lea.vmem %s1461_s2, %s1311_s20  ;;  %s439_s13 = scalar_lea.vmem %s1462_s3, %s1311_s20 }
  0x10   : > { %vm445_vm0 = vcmask 257024   ;;  %v1234_v0 = vmov 0.0  }
  0x11   : > { %446 = vst.msk [vmem:[#allocation2] sm:$0xf] %vm445_vm0, %v1234_v0  ;;  %447 = vst.msk [vmem:[#allocation3] sm:$0xf] %vm445_vm0, %v1234_v0 }
  0x12 PF: > { %s1330_s14 = smov 0  }
  0x13 LB: >> { %v462_v1 = vld [vmem:[%s1463_s4 + $0x18] sm:$0xff]  ;;  %v1235_v3 = vmov 0.0   ;;  %v461_v4 = vld [vmem:[%s1463_s4 + $0x10] sm:$0xff]  ;;  %v460_v6 = vld [vmem:[%s1463_s4 + $0x8] sm:$0xff]  ;;  %vm463_vm1 = vcmask 261120   ;;  %vm1236_vm2 = vmmov 0   ;;  %s1232_s14 = sphi %s1330_s14, %s453_s14  }
  0x14   : >> { %v1040_v2 = vld [vmem:[%s1463_s4 + $0x38] sm:$0xff]  ;;  %1089 = vmatprep.subr.mxu0 %v1235_v3  ;;  %1100 = vmatprep.subr.mxu1 %v1235_v3  ;;  %v1039_v5 = vld [vmem:[%s1463_s4 + $0x30] sm:$0xff]  ;;  %v1038_v7 = vld [vmem:[%s1463_s4 + $0x28] sm:$0xff]  ;;  %s1034_s12 = sshll.u32 %s1232_s14, 2  ;;  %vm796_vm3 = vcmask 257024   ;;  %s453_s14 = sadd.s32 1, %s1232_s14  }
  0x15   : >> { %1090 = vmatpush3.msra.mxu0 %v462_v1  ;;  %1101 = vmatpush3.msra.mxu1 %v1040_v2  ;;  %v459_v8 = vld [vmem:[%s1463_s4] sm:$0xff]  ;;  %v1046_v11 = vld [vmem:[%s1463_s4 + $0x58] sm:$0xff]  ;;  %v1045_v13 = vld [vmem:[%s1463_s4 + $0x50] sm:$0xff]  ;;  %s457_s19 = scalar_lea.vmem %s421_s23, %s1034_s12  ;;  %s544_s24 = scalar_lea.vmem %s427_s26, %s1034_s12 }
  0x16   : >> { %1091 = vmatprep.subr.mxu0 %v1235_v3  ;;  %1102 = vmatprep.subr.mxu1 %v1235_v3  ;;  %v1037_v9 = vld [vmem:[%s1463_s4 + $0x20] sm:$0xff]  ;;  %v1051_v12 = vld [vmem:[%s1463_s4 + $0x78] sm:$0xff]  ;;  %v1050_v14 = vld [vmem:[%s1463_s4 + $0x70] sm:$0xff]  ;;  %s707_s28 = scalar_lea.vmem %s439_s13, %s1034_s12  ;;  %s628_s16 = scalar_lea.vmem %s433_s29, %s1034_s12 }
  0x17   : >> { %1092 = vmatpush3.msra.mxu0 %v461_v4  ;;  %1103 = vmatpush3.msra.mxu1 %v1039_v5  ;;  %v1044_v15 = vld [vmem:[%s1463_s4 + $0x48] sm:$0xff]  ;;  %v1043_v17 = vld [vmem:[%s1463_s4 + $0x40] sm:$0xff]  ;;  %p450_p5 = scmp.ge.s32.totalorder %s453_s14, 4  }
  0x18   : >> { %1093 = vmatprep.subr.mxu0 %v1235_v3  ;;  %1104 = vmatprep.subr.mxu1 %v1235_v3  ;;  %v454_v10 = vld [vmem:[#allocation2] sm:$0xf]  ;;  %v1049_v16 = vld [vmem:[%s1463_s4 + $0x68] sm:$0xff]  ;;  %v455_v44 = vld [vmem:[#allocation3] sm:$0xf]  ;;  %p1054_p6 = scmp.ne.s32.totalorder (%p450_p5), %s1306_s18, 1 }
  0x19   : >> { %1094 = vmatpush3.msra.mxu0 %v460_v6  ;;  %1105 = vmatpush3.msra.mxu1 %v1038_v7  ;;  %v1048_v18 = vld [vmem:[%s1463_s4 + $0x60] sm:$0xff] }
  0x1a   : >> { %1095 = vmatprep.subr.mxu0 %v1235_v3  ;;  %1106 = vmatprep.subr.mxu1 %v1235_v3  ;;  %v458_v19 = vld [vmem:[%s457_s19] sm:$0xf] }
  0x1b   : >> { %1096 = vmatpush3.msra.mxu0 %v459_v8  ;;  %1097 = vmatprep.mubr.msk.f32.mxu0 %vm1236_vm2, %v1235_v3  ;;  %v545_v20 = vld [vmem:[%s544_s24] sm:$0xf] }
  0x1c   : >> { %1107 = vmatpush3.msra.mxu1 %v1037_v9  ;;  %1108 = vmatprep.mubr.msk.f32.mxu1 %vm1236_vm2, %v1235_v3  ;;  %v708_v29 = vld [vmem:[%s707_s28] sm:$0xf] }
  0x1d   : >> { %1098 = vmatmul.mubr.msk.f32.vlgmr.msra.gmra.mxu0 %vm463_vm1, %v454_v10  ;;  %1109 = vmatmul.mubr.msk.f32.vlgmr.msra.gmra.mxu1 %vm463_vm1, %v454_v10  ;;  %v629_v33 = vld [vmem:[%s628_s16] sm:$0xf] }
  0x1e   : >> { %1111 = vmatprep.subr.mxu0 %v1235_v3  ;;  %1122 = vmatprep.subr.mxu1 %v1235_v3 }
  0x1f   : >> { %1112 = vmatpush3.msra.mxu0 %v1046_v11  ;;  %1123 = vmatpush3.msra.mxu1 %v1051_v12 }
  0x20   : >> { %1113 = vmatprep.subr.mxu0 %v1235_v3  ;;  %1124 = vmatprep.subr.mxu1 %v1235_v3 }
  0x21   : >> { %1114 = vmatpush3.msra.mxu0 %v1045_v13  ;;  %1125 = vmatpush3.msra.mxu1 %v1050_v14 }
  0x22   : >> { %1115 = vmatprep.subr.mxu0 %v1235_v3  ;;  %1126 = vmatprep.subr.mxu1 %v1235_v3 }
  0x23   : >> { %1116 = vmatpush3.msra.mxu0 %v1044_v15  ;;  %1127 = vmatpush3.msra.mxu1 %v1049_v16 }
  0x24   : >> { %1117 = vmatprep.subr.mxu0 %v1235_v3  ;;  %1128 = vmatprep.subr.mxu1 %v1235_v3 }
  0x25   : >> { %1118 = vmatpush3.msra.mxu0 %v1043_v17  ;;  %1119 = vmatprep.mubr.msk.f32.mxu0 %vm1236_vm2, %v1235_v3 }
  0x26   : >> { %1129 = vmatpush3.msra.mxu1 %v1048_v18  ;;  %1130 = vmatprep.mubr.msk.f32.mxu1 %vm1236_vm2, %v1235_v3 }
  0x27   : >> { %1120 = vmatmul.mubr.msk.f32.vlgmr.msra.gmra.mxu0 %vm463_vm1, %v454_v10  ;;  %1131 = vmatmul.mubr.msk.f32.vlgmr.msra.gmra.mxu1 %vm463_vm1, %v454_v10 }
  0xdd   : >> { %v533_v21 = vpop.f32.mrf.mxu0  ;;  %v617_v22 = vpop.f32.mrf.mxu1 }
  0xde   : >> { %v537_v23 = vadd.f32 %v533_v21, %v458_v19  ;;  %v621_v24 = vadd.f32 %v617_v22, %v545_v20 }
  0xdf   : >> { %v1099_v25 = vpop.f32.mrf.mxu0  ;;  %v1110_v26 = vpop.f32.mrf.mxu1 }
  0xe0   : >> { %v1036_v27 = vmul.f32 -1.442695, %v537_v23  ;;  %v1042_v28 = vmul.f32 -1.442695, %v621_v24 }
  0xe2   : >> { %1172 = vpow2.f32 %v1036_v27 }
  0xe3   : >> { %1174 = vpow2.f32 %v1042_v28 }
  0xe7   : >> { %v701_v30 = vpop.f32.mrf.mxu0  ;;  %v780_v31 = vpop.f32.mrf.mxu1 }
  0xe8   : >> { %v784_v32 = vadd.f32 %v780_v31, %v708_v29  ;;  %v705_v37 = vadd.f32 %v701_v30, %v629_v33 }
  0xe9   : >> { %v1121_v34 = vpop.f32.mrf.mxu0  ;;  %v1132_v35 = vpop.f32.mrf.mxu1 }
  0xea   : >> { %v1053_v36 = vmul.f32 -1.442695, %v784_v32 }
  0xec   : >> { %1176 = vpow2.f32 %v1053_v36 }
  0xed   : >> { %1178 = vtanh.f32 %v705_v37 }
  0xef   : >> { %v1173_v38 = vpop.eup %1172 }
  0xf0   : >> { %v1175_v39 = vpop.eup %1174  ;;  %v541_v40 = vadd.f32 1.0, %v1173_v38 }
  0xf1   : >> { %v625_v41 = vadd.f32 1.0, %v1175_v39 }
  0xf2   : >> { %1180 = vrcp.f32 %v541_v40 }
  0xf3   : >> { %1182 = vrcp.f32 %v625_v41 }
  0xf9   : >> { %v1177_v42 = vpop.eup %1176 }
  0xfa   : >> { %v1179_v43 = vpop.eup %1178  ;;  %v788_v46 = vadd.f32 1.0, %v1177_v42 }
  0xfc   : >> { %1184 = vrcp.f32 %v788_v46 }
  0xff   : >> { %v1181_v45 = vpop.eup %1180 }
 0x100   : >> { %v1183_v47 = vpop.eup %1182  ;;  %v792_v48 = vmul.f32 %v1181_v45, %v1179_v43 }
 0x101   : >> { %v791_v49 = vmul.f32 %v1183_v47, %v455_v44 }
 0x103   : >> { %v793_v50 = vadd.f32 %v792_v48, %v791_v49 }
 0x105   : >> { %1186 = vtanh.f32 %v793_v50  ;;  %797 = vst.msk [vmem:[#allocation3] sm:$0xf] %vm796_vm3, %v793_v50 }
 0x109   : >> { %v1185_v51 = vpop.eup %1184 }
 0x111   : > { %452 = sbr.rel (!%p450_p5) target bundleno = 19 (0x13), region = 122 }
 0x112   : >> { %v1187_v52 = vpop.eup %1186 }
 0x113   : >> { %v795_v53 = vmul.f32 %v1187_v52, %v1185_v51 }
 0x115   : >> { %798 = vst.msk [vmem:[#allocation2] sm:$0xf] %vm796_vm3, %v795_v53 }
 0x116   : > { %802 = sbr.rel (%p1054_p6) target bundleno = 506 (0x1fa), region = 79 }
 0x11b   : > { %v842_v54 = vld [vmem:[%s1468_s9 + $0x18] sm:$0xff]  ;;  %v1237_v55 = vmov 0.0   ;;  %v841_v56 = vld [vmem:[%s1468_s9 + $0x10] sm:$0xff]  ;;  %vm1238_vm4 = vmmov 0   ;;  %v804_v57 = vld [vmem:[%s1467_s8] sm:$0x1]  ;;  %v816_v61 = vlaneseq }
 0x11c   : > { %1133 = vmatprep.subr.mxu0 %v1237_v55  ;;  %1141 = vmatprep.mubr.msk.f32.mxu0 %vm1238_vm4, %v1237_v55  ;;  %v805_v58 = vadd.f32 1e-05, %v804_v57  ;;  %v840_v59 = vld [vmem:[%s1468_s9 + $0x8] sm:$0xff]  ;;  %v839_v60 = vld [vmem:[%s1468_s9] sm:$0xff]  ;;  %vm924_vm5 = vcmask 60416  }
 0x11d   : > { %1134 = vmatpush3.msra.mxu0 %v842_v54  ;;  %v817_v62 = vshrl.u32 %v816_v61, 7  ;;  %v803_v63 = vld [vmem:[#allocation2] sm:$0xf] }
 0x11e   : > { %1135 = vmatprep.subr.mxu0 %v1237_v55  ;;  %1188 = vrsqrt.f32 %v805_v58  ;;  %v1055_v0 = vld [vmem:[%s1466_s7] ss:$0 sm:$0xff] }
 0x11f   : > { %1136 = vmatpush3.msra.mxu0 %v841_v56  ;;  %v818_v1 = vsub.s32 0, %v817_v62  ;;  %v814_v2 = vsub.f32 %v803_v63, %v1055_v0  ;;  %v1056_v5 = vld [vmem:[%s1464_s5] ss:$0 sm:$0xff] }
 0x120   : > { %1137 = vmatprep.subr.mxu0 %v1237_v55  ;;  %v1057_v7 = vld [vmem:[%s1465_s6] ss:$0 sm:$0xff] }
 0x121   : > { %1138 = vmatpush3.msra.mxu0 %v840_v59  ;;  %v1058_v11 = vld [vmem:[%s1469_s10] ss:$0 sm:$0xff] }
 0x122   : > { %1139 = vmatprep.subr.mxu0 %v1237_v55 }
 0x123   : > { %1140 = vmatpush3.msra.mxu0 %v839_v60 }
 0x12b   : > { %v1189_v3 = vpop.eup %1188 }
 0x12c   : > { %v819_v4 = vrot.slane %v1189_v3, %v818_v1 }
 0x12e   : > { %v821_v6 = vmul.f32 %v819_v4, %v814_v2 }
 0x130   : > { %v829_v8 = vmul.f32 %v1056_v5, %v821_v6 }
 0x132   : > { %v837_v9 = vadd.f32 %v1057_v7, %v829_v8 }
 0x134   : > { %v838_v10 = vmax.f32 %v837_v9, 0.0 }
 0x136   : > { %1142 = vmatmul.mubr.msk.f32.vlgmr.msra.gmra.mxu0 %vm463_vm1, %v838_v10 }
 0x1f6   : > { %v920_v12 = vpop.f32.mrf.mxu0 }
 0x1f7   : > { %v921_v13 = vadd.f32 %v1058_v11, %v920_v12 }
 0x1f8   : > { %v1143_v14 = vpop.f32.mrf.mxu0 }
 0x1f9   : > { %925 = vst.msk [vmem:[#allocation4] sm:$0xf] %vm924_vm5, %v921_v13 }
 0x1fa PF: > { %p1148_p7 = scmp.eq.s32.totalorder %s1306_s18, 1  ;;  %s1239_s19 = smov [#allocation4]  }
 0x1fb   : > { %s933_s21 = sshll.u32 %s1239_s19, 4  ;;  %s934_s21 = int_to_ptr.vmem [resolvable:$true] %s933_s21 }
 0x1fc   : > { %s1190_s22 = scalar_lea.vmem %s934_s21, 64  ;;  %p1197_p11 = scmp.lt.s32.totalorder %s934_s21, %s934_s21 }
 0x1fd   : > { %p1191_p8 = scmp.ne.s32.totalorder %s934_s21, %s1190_s22  ;;  %p1198_p12 = scmp.lt.s32.totalorder %s1190_s22, %s1190_s22 }
 0x1ff   : > { %p1192_p9 = pnand %p1191_p8, %p1148_p7  ;;  %p1199_p13 = por %p1198_p12, %p1197_p11 }
 0x201   : > { %p1193_p10 = pneg %p1192_p9 }
 0x203   : > { %p1200_p0 = pnand %p1199_p13, %p1193_p10 }
 0x205   : > { %1203 = shalt.err (!%p1200_p0)
}
 0x206   : > { %1145 = dma.vmem_to_hbm [thread:$0]  (%p1148_p7), %s934_s21, 64, %s1470_s11, [#allocation5]  }
 0x207   : > { %1223 = dma.done.wait (%p1148_p7), [#allocation5], 64  }
 0x208   : > { %1225 = vsyncadd (%p1148_p7), [#allocation5], 4294967232 }
 0x209 PF: > { %s22_s17 = sadd.s32 1, %s1228_s17  }
 0x20a   : > { %p19_p1 = scmp.ge.s32.totalorder %s22_s17, 4  }
 0x20c   :  { %21 = sbr.rel (!%p19_p1) target bundleno = 1 (0x1), region = 133 }
 0x211   :  { %946 = vsyncpa [#allocation5], 1 }
 0x212   :  { %948 = vsyncpa [#allocation5 + $0x1], 1 }

</bundles_post_ra>
